<compile_context>
chip_gen: v6e
topology: v6e:2x2x1
jax: 0.10.0
libtpu: 0.0.40
codegen_flags: <defaults>
</compile_context>

<pallas_src>
import functools
import math

import jax
import jax.numpy as jnp
from jax.experimental import pallas as pl
from jax.experimental.pallas import tpu as pltpu

VMEM = pltpu.MemorySpace.VMEM
SMEM = pltpu.MemorySpace.SMEM

CFG = dict(vocab=50, max_pos=32, type_vocab=2, hidden=32, heads=2,
           intermediate=64, num_layers=2, label_size=4)


# ------------------------------ fused kernel -------------------------------

def _layernorm(x, g, b, eps):
    mean = jnp.mean(x, axis=-1, keepdims=True)
    var = jnp.mean(jnp.square(x - mean), axis=-1, keepdims=True)
    return (x - mean) * jax.lax.rsqrt(var + eps) * g + b


def _bert_fc_fused_kernel(
        emb_ref, bias_ref, labels_ref,
        emb_g_ref, emb_b_ref,
        qkv_w_ref, qkv_b_ref, wo_ref, bo_ref, ln1_g_ref, ln1_b_ref,
        wi_ref, bi_ref, wp_ref, bp_ref, ln2_g_ref, ln2_b_ref,
        pool_w_ref, pool_b_ref, cls_w_ref, cls_b_ref,
        best_ref, loss_ref,
        *, num_layers, B, S, H, nh, dh, num_labels, eps):
    BS = B * S
    f32 = jnp.float32

    # --- embedding LayerNorm (no residual; dropout = identity at inference) ---
    x = _layernorm(emb_ref[...], emb_g_ref[...], emb_b_ref[...], eps)
    bias = bias_ref[...]                 # (B*nh, 1, S) additive attention mask

    # --- transformer layers, fully VMEM-resident ---
    for l in range(num_layers):
        # fused QKV projection: one (BS, H) @ (H, 3H) MXU push.
        # 1/sqrt(dh) is already folded into the Q columns of qkv_w / qkv_b.
        qkv = jnp.dot(x, qkv_w_ref[l], preferred_element_type=f32) + qkv_b_ref[l]

        def split_heads(off):
            # (BS, H)-slice of qkv -> (B*nh, S, dh); static slices, major-dim stack.
            return jnp.stack(
                [qkv[b * S:(b + 1) * S, off + h * dh:off + (h + 1) * dh]
                 for b in range(B) for h in range(nh)], axis=0)

        q = split_heads(0)
        k = split_heads(H)
        v = split_heads(2 * H)

        # batched attention over the (B*nh) batch dim (two batched contractions)
        s = jnp.einsum('bqd,bkd->bqk', q, k, preferred_element_type=f32) + bias
        s = s - jnp.max(s, axis=-1, keepdims=True)
        p = jnp.exp(s)
        p = p * pl.reciprocal(jnp.sum(p, axis=-1, keepdims=True), approx=True)
        ctx = jnp.einsum('bqk,bkd->bqd', p, v, preferred_element_type=f32)

        # merge_heads folded into the output projection:
        #   ctx @ Wo == sum_h ctx_h @ Wo[h*dh:(h+1)*dh, :]
        ctx4 = ctx.reshape(B, nh, S, dh)
        wo = wo_ref[l]
        attn = jnp.zeros((BS, H), f32)
        for h in range(nh):
            ctx_h = ctx4[:, h].reshape(BS, dh)         # layout-trivial reshape
            attn = attn + jnp.dot(ctx_h, wo[h * dh:(h + 1) * dh, :],
                                  preferred_element_type=f32)
        x = _layernorm(attn + bo_ref[l] + x, ln1_g_ref[l], ln1_b_ref[l], eps)

        # FFN
        hmid = jnp.dot(x, wi_ref[l], preferred_element_type=f32) + bi_ref[l]
        # TODO(synk): HF BERT uses erf-gelu; tanh-approx gelu used for clean EUP lowering.
        hmid = jax.nn.gelu(hmid, approximate=True)
        ffn = jnp.dot(hmid, wp_ref[l], preferred_element_type=f32) + bp_ref[l]
        x = _layernorm(ffn + x, ln2_g_ref[l], ln2_b_ref[l], eps)

    # --- pooler: tanh(Linear(hidden state of [CLS] token)) ---
    cls_tok = x.reshape(B, S, H)[:, 0, :]                         # (B, H)
    pooled = jnp.tanh(jnp.dot(cls_tok, pool_w_ref[...], preferred_element_type=f32)
                      + pool_b_ref[...])
    # dropout(pooled) = identity at inference.

    # --- classifier head: logits, argmax, CE loss (ignore_index=-1) ---
    logits = (jnp.dot(pooled, cls_w_ref[...], preferred_element_type=f32)
              + cls_b_ref[...])

    class_iota = jax.lax.broadcasted_iota(jnp.int32, (B, num_labels), 1)
    max_val = jnp.max(logits, axis=-1, keepdims=True)
    best = jnp.min(jnp.where(logits == max_val, class_iota, num_labels),
                   axis=-1, keepdims=True)      # first-max index, matches torch
    best_ref[...] = best.astype(jnp.int32)

    # CrossEntropyLoss(ignore_index=-1), mean over non-ignored examples.
    # All-ignored batch -> 0/0 (NaN), matching torch.  Cold code, B is tiny.
    row_iota = jax.lax.broadcasted_iota(jnp.int32, (1, num_labels), 1)
    total = jnp.zeros((1, 1), f32)
    count = jnp.zeros((1, 1), f32)
    for b in range(B):
        lbl = labels_ref[b]                                      # SMEM scalar
        row = logits[b:b + 1, :]
        m = jnp.max(row, axis=-1, keepdims=True)
        lse = m + jnp.log(jnp.sum(jnp.exp(row - m), axis=-1, keepdims=True))
        picked = jnp.sum(jnp.where(row_iota == lbl, row, 0.0), axis=-1, keepdims=True)
        valid = (lbl != -1).astype(f32)
        total = total + (lse - picked) * valid
        count = count + valid
    loss_ref[...] = total / count


# ------------------------------ params & packing ---------------------------

def init_params(key, cfg):
    H, I, L = cfg["hidden"], cfg["intermediate"], cfg["label_size"]
    keys = iter(jax.random.split(key, 128))

    def norm(shape):
        return jax.random.normal(next(keys), shape, jnp.float32) * 0.02

    def zeros(shape):
        return jnp.zeros(shape, jnp.float32)

    params = dict(
        word_emb=norm((cfg["vocab"], H)),
        pos_emb=norm((cfg["max_pos"], H)),
        type_emb=norm((cfg["type_vocab"], H)),
        emb_ln_g=jnp.ones((1, H), jnp.float32), emb_ln_b=zeros((1, H)),
        layers=[],
        pooler_w=norm((H, H)), pooler_b=zeros((1, H)),
        # self.linear exists in the module but is only used in the Electra branch.
        fc_w=norm((H, H)), fc_b=zeros((1, H)),
        cls_w=norm((H, L)), cls_b=zeros((1, L)),
    )
    for _ in range(cfg["num_layers"]):
        params["layers"].append(dict(
            wq=norm((H, H)), bq=zeros((1, H)),
            wk=norm((H, H)), bk=zeros((1, H)),
            wv=norm((H, H)), bv=zeros((1, H)),
            wo=norm((H, H)), bo=zeros((1, H)),
            ln1_g=jnp.ones((1, H), jnp.float32), ln1_b=zeros((1, H)),
            wi=norm((H, I)), bi=zeros((1, I)),
            wp=norm((I, H)), bp=zeros((1, H)),
            ln2_g=jnp.ones((1, H), jnp.float32), ln2_b=zeros((1, H)),
        ))
    return params


def pack_params(params, cfg):
    """One-time weight preprocessing (hoisted out of the per-call forward):
    fuse QKV per layer, stack layers, fold 1/sqrt(dh) into Wq / bq."""
    H, nh = cfg["hidden"], cfg["heads"]
    scale = 1.0 / math.sqrt(H // nh)
    lys = params["layers"]
    return dict(
        word_emb=params["word_emb"], pos_emb=params["pos_emb"],
        type_emb=params["type_emb"],
        emb_ln_g=params["emb_ln_g"], emb_ln_b=params["emb_ln_b"],
        qkv_w=jnp.stack([jnp.concatenate([l["wq"] * scale, l["wk"], l["wv"]], axis=1)
                         for l in lys]),
        qkv_b=jnp.stack([jnp.concatenate([l["bq"] * scale, l["bk"], l["bv"]], axis=1)
                         for l in lys]),
        wo=jnp.stack([l["wo"] for l in lys]), bo=jnp.stack([l["bo"] for l in lys]),
        ln1_g=jnp.stack([l["ln1_g"] for l in lys]),
        ln1_b=jnp.stack([l["ln1_b"] for l in lys]),
        wi=jnp.stack([l["wi"] for l in lys]), bi=jnp.stack([l["bi"] for l in lys]),
        wp=jnp.stack([l["wp"] for l in lys]), bp=jnp.stack([l["bp"] for l in lys]),
        ln2_g=jnp.stack([l["ln2_g"] for l in lys]),
        ln2_b=jnp.stack([l["ln2_b"] for l in lys]),
        pooler_w=params["pooler_w"], pooler_b=params["pooler_b"],
        cls_w=params["cls_w"], cls_b=params["cls_b"],
    )


# ------------------------------ forward (glue) ------------------------------

def bert_fc_forward(packed, input_ids, attention_mask, token_type_ids=None,
                    labels=None):
    cfg = CFG
    B, S = input_ids.shape
    H, nh = cfg["hidden"], cfg["heads"]
    NL = cfg["label_size"]
    L = cfg["num_layers"]
    dh = H // nh
    BS = B * S

    if token_type_ids is None:
        token_type_ids = jnp.zeros_like(input_ids)

    # --- embedding table lookups (gather only; everything else is in-kernel) ---
    positions = jnp.arange(S, dtype=jnp.int32)[None, :]
    emb = (packed["word_emb"][input_ids]
           + packed["pos_emb"][positions]
           + packed["type_emb"][token_type_ids]).reshape(BS, H)

    # additive attention mask, one row per (batch, head): (B*nh, 1, S)
    attn_bias = (1.0 - attention_mask.astype(jnp.float32)) * -1e9
    attn_bias = jnp.repeat(attn_bias, nh, axis=0).reshape(B * nh, 1, S)

    if labels is None:
        labels_arr = jnp.full((B,), -1, jnp.int32)
    else:
        labels_arr = labels.astype(jnp.int32).reshape(B)

    kernel = functools.partial(
        _bert_fc_fused_kernel, num_layers=L, B=B, S=S, H=H, nh=nh, dh=dh,
        num_labels=NL, eps=1e-12)

    best, loss = pl.pallas_call(
        kernel,
        out_shape=(
            jax.ShapeDtypeStruct((B, 1), jnp.int32),      # best labels
            jax.ShapeDtypeStruct((1, 1), jnp.float32),    # loss
        ),
        in_specs=(
            [pl.BlockSpec(memory_space=VMEM),             # emb
             pl.BlockSpec(memory_space=VMEM),             # attention bias
             pl.BlockSpec(memory_space=SMEM)]             # labels (scalar reads)
            + [pl.BlockSpec(memory_space=VMEM)] * 18),    # all weights
        out_specs=(pl.BlockSpec(memory_space=VMEM),
                   pl.BlockSpec(memory_space=VMEM)),
        compiler_params=pltpu.CompilerParams(vmem_limit_bytes=32 * 1024 * 1024),
    )(emb, attn_bias, labels_arr,
      packed["emb_ln_g"], packed["emb_ln_b"],
      packed["qkv_w"], packed["qkv_b"], packed["wo"], packed["bo"],
      packed["ln1_g"], packed["ln1_b"], packed["wi"], packed["bi"],
      packed["wp"], packed["bp"], packed["ln2_g"], packed["ln2_b"],
      packed["pooler_w"], packed["pooler_b"], packed["cls_w"], packed["cls_b"])

    best_labels = best.reshape(B)
    if labels is not None:
        return best_labels, loss.reshape(())
    return best_labels


# ---------------------------------- main -----------------------------------

if __name__ == "__main__":
    key = jax.random.PRNGKey(0)
    pkey, ikey = jax.random.split(key)
    params = init_params(pkey, CFG)
    packed = pack_params(params, CFG)          # one-time weight packing

    B, S = 2, 8
    input_ids = jax.random.randint(ikey, (B, S), 0, CFG["vocab"], dtype=jnp.int32)
    attention_mask = jnp.array([[1] * 8, [1] * 5 + [0] * 3], dtype=jnp.int32)
    token_type_ids = jnp.zeros((B, S), dtype=jnp.int32)
    labels = jnp.array([2, -1], dtype=jnp.int32)   # -1 exercises ignore_index

    fwd = jax.jit(bert_fc_forward)
    best_labels, loss = fwd(packed, input_ids, attention_mask, token_type_ids, labels)
    jax.block_until_ready((best_labels, loss))
    assert best_labels.shape == (B,) and best_labels.dtype == jnp.int32
    assert loss.shape == () and bool(jnp.isfinite(loss))
    print("KERNEL_OK")
</pallas_src>

<mosaic_0001>
module attributes {stable_mosaic.version = 11 : i64} {
  func.func @_bert_fc_fused_kernel(%arg0: memref<16x32xf32, #tpu.memory_space<vmem>>, %arg1: memref<4x1x8xf32, #tpu.memory_space<vmem>>, %arg2: memref<2xi32, #tpu.memory_space<smem>>, %arg3: memref<1x32xf32, #tpu.memory_space<vmem>>, %arg4: memref<1x32xf32, #tpu.memory_space<vmem>>, %arg5: memref<2x32x96xf32, #tpu.memory_space<vmem>>, %arg6: memref<2x1x96xf32, #tpu.memory_space<vmem>>, %arg7: memref<2x32x32xf32, #tpu.memory_space<vmem>>, %arg8: memref<2x1x32xf32, #tpu.memory_space<vmem>>, %arg9: memref<2x1x32xf32, #tpu.memory_space<vmem>>, %arg10: memref<2x1x32xf32, #tpu.memory_space<vmem>>, %arg11: memref<2x32x64xf32, #tpu.memory_space<vmem>>, %arg12: memref<2x1x64xf32, #tpu.memory_space<vmem>>, %arg13: memref<2x64x32xf32, #tpu.memory_space<vmem>>, %arg14: memref<2x1x32xf32, #tpu.memory_space<vmem>>, %arg15: memref<2x1x32xf32, #tpu.memory_space<vmem>>, %arg16: memref<2x1x32xf32, #tpu.memory_space<vmem>>, %arg17: memref<32x32xf32, #tpu.memory_space<vmem>>, %arg18: memref<1x32xf32, #tpu.memory_space<vmem>>, %arg19: memref<32x4xf32, #tpu.memory_space<vmem>>, %arg20: memref<1x4xf32, #tpu.memory_space<vmem>>, %arg21: memref<2x1xi32, #tpu.memory_space<vmem>>, %arg22: memref<1x1xf32, #tpu.memory_space<vmem>>) attributes {dimension_semantics = [], scalar_prefetch = 0 : i64, scratch_operands = 0 : i64, tpu.core_type = #tpu.core_type<tc>} {
    %c0 = arith.constant 0 : index
    %c0_0 = arith.constant 0 : index
    %0 = vector.load %arg0[%c0, %c0_0] : memref<16x32xf32, #tpu.memory_space<vmem>>, vector<16x32xf32>
    %c0_1 = arith.constant 0 : index
    %c0_2 = arith.constant 0 : index
    %1 = vector.load %arg3[%c0_1, %c0_2] : memref<1x32xf32, #tpu.memory_space<vmem>>, vector<1x32xf32>
    %c0_3 = arith.constant 0 : index
    %c0_4 = arith.constant 0 : index
    %2 = vector.load %arg4[%c0_3, %c0_4] : memref<1x32xf32, #tpu.memory_space<vmem>>, vector<1x32xf32>
    %cst = arith.constant dense<0.000000e+00> : vector<16xf32>
    %3 = vector.multi_reduction <add>, %0, %cst [1] : vector<16x32xf32> to vector<16xf32>
    %4 = vector.shape_cast %3 : vector<16xf32> to vector<16x1xf32>
    %cst_5 = arith.constant 3.200000e+01 : f32
    %5 = vector.broadcast %cst_5 : f32 to vector<16x1xf32>
    %6 = arith.divf %4, %5 : vector<16x1xf32>
    %7 = vector.broadcast %6 : vector<16x1xf32> to vector<16x32xf32>
    %8 = arith.subf %0, %7 : vector<16x32xf32>
    %9 = arith.mulf %8, %8 : vector<16x32xf32>
    %cst_6 = arith.constant dense<0.000000e+00> : vector<16xf32>
    %10 = vector.multi_reduction <add>, %9, %cst_6 [1] : vector<16x32xf32> to vector<16xf32>
    %11 = vector.shape_cast %10 : vector<16xf32> to vector<16x1xf32>
    %cst_7 = arith.constant 3.200000e+01 : f32
    %12 = vector.broadcast %cst_7 : f32 to vector<16x1xf32>
    %13 = arith.divf %11, %12 : vector<16x1xf32>
    %14 = vector.broadcast %6 : vector<16x1xf32> to vector<16x32xf32>
    %15 = arith.subf %0, %14 : vector<16x32xf32>
    %cst_8 = arith.constant 9.99999996E-13 : f32
    %16 = vector.broadcast %cst_8 : f32 to vector<16x1xf32>
    %17 = arith.addf %13, %16 : vector<16x1xf32>
    %18 = math.rsqrt %17 : vector<16x1xf32>
    %19 = vector.broadcast %18 : vector<16x1xf32> to vector<16x32xf32>
    %20 = arith.mulf %15, %19 : vector<16x32xf32>
    %21 = vector.broadcast %1 : vector<1x32xf32> to vector<16x32xf32>
    %22 = arith.mulf %20, %21 : vector<16x32xf32>
    %23 = vector.broadcast %2 : vector<1x32xf32> to vector<16x32xf32>
    %24 = arith.addf %22, %23 : vector<16x32xf32>
    %c0_9 = arith.constant 0 : index
    %c0_10 = arith.constant 0 : index
    %c0_11 = arith.constant 0 : index
    %25 = vector.load %arg1[%c0_9, %c0_10, %c0_11] : memref<4x1x8xf32, #tpu.memory_space<vmem>>, vector<4x1x8xf32>
    %c0_12 = arith.constant 0 : index
    %c0_13 = arith.constant 0 : index
    %c0_14 = arith.constant 0 : index
    %26 = vector.load %arg5[%c0_12, %c0_13, %c0_14] : memref<2x32x96xf32, #tpu.memory_space<vmem>>, vector<1x32x96xf32>
    %27 = vector.shape_cast %26 : vector<1x32x96xf32> to vector<32x96xf32>
    %cst_15 = arith.constant dense<0.000000e+00> : vector<16x96xf32>
    %28 = tpu.matmul %24, %27, %cst_15 {dimension_numbers = #tpu.dot_dimension_numbers<[1], [0], [0], [1], [0, 0, 1, 1], [], []>} : vector<16x32xf32>, vector<32x96xf32>, vector<16x96xf32> -> vector<16x96xf32>
    %c0_16 = arith.constant 0 : index
    %c0_17 = arith.constant 0 : index
    %c0_18 = arith.constant 0 : index
    %29 = vector.load %arg6[%c0_16, %c0_17, %c0_18] : memref<2x1x96xf32, #tpu.memory_space<vmem>>, vector<1x1x96xf32>
    %30 = vector.shape_cast %29 : vector<1x1x96xf32> to vector<1x96xf32>
    %31 = vector.broadcast %30 : vector<1x96xf32> to vector<16x96xf32>
    %32 = arith.addf %28, %31 : vector<16x96xf32>
    %33 = vector.extract_strided_slice %32 {offsets = [0, 0], sizes = [8, 16], strides = [1, 1]} : vector<16x96xf32> to vector<8x16xf32>
    %34 = vector.extract_strided_slice %32 {offsets = [0, 16], sizes = [8, 16], strides = [1, 1]} : vector<16x96xf32> to vector<8x16xf32>
    %35 = vector.extract_strided_slice %32 {offsets = [8, 0], sizes = [8, 16], strides = [1, 1]} : vector<16x96xf32> to vector<8x16xf32>
    %36 = vector.extract_strided_slice %32 {offsets = [8, 16], sizes = [8, 16], strides = [1, 1]} : vector<16x96xf32> to vector<8x16xf32>
    %37 = vector.shape_cast %33 : vector<8x16xf32> to vector<1x8x16xf32>
    %38 = vector.shape_cast %34 : vector<8x16xf32> to vector<1x8x16xf32>
    %39 = vector.shape_cast %35 : vector<8x16xf32> to vector<1x8x16xf32>
    %40 = vector.shape_cast %36 : vector<8x16xf32> to vector<1x8x16xf32>
    %41 = tpu.concatenate %37, %38, %39, %40 in 0 : vector<1x8x16xf32>, vector<1x8x16xf32>, vector<1x8x16xf32>, vector<1x8x16xf32> -> vector<4x8x16xf32>
    %42 = vector.extract_strided_slice %32 {offsets = [0, 32], sizes = [8, 16], strides = [1, 1]} : vector<16x96xf32> to vector<8x16xf32>
    %43 = vector.extract_strided_slice %32 {offsets = [0, 48], sizes = [8, 16], strides = [1, 1]} : vector<16x96xf32> to vector<8x16xf32>
    %44 = vector.extract_strided_slice %32 {offsets = [8, 32], sizes = [8, 16], strides = [1, 1]} : vector<16x96xf32> to vector<8x16xf32>
    %45 = vector.extract_strided_slice %32 {offsets = [8, 48], sizes = [8, 16], strides = [1, 1]} : vector<16x96xf32> to vector<8x16xf32>
    %46 = vector.shape_cast %42 : vector<8x16xf32> to vector<1x8x16xf32>
    %47 = vector.shape_cast %43 : vector<8x16xf32> to vector<1x8x16xf32>
    %48 = vector.shape_cast %44 : vector<8x16xf32> to vector<1x8x16xf32>
    %49 = vector.shape_cast %45 : vector<8x16xf32> to vector<1x8x16xf32>
    %50 = tpu.concatenate %46, %47, %48, %49 in 0 : vector<1x8x16xf32>, vector<1x8x16xf32>, vector<1x8x16xf32>, vector<1x8x16xf32> -> vector<4x8x16xf32>
    %51 = vector.extract_strided_slice %32 {offsets = [0, 64], sizes = [8, 16], strides = [1, 1]} : vector<16x96xf32> to vector<8x16xf32>
    %52 = vector.extract_strided_slice %32 {offsets = [0, 80], sizes = [8, 16], strides = [1, 1]} : vector<16x96xf32> to vector<8x16xf32>
    %53 = vector.extract_strided_slice %32 {offsets = [8, 64], sizes = [8, 16], strides = [1, 1]} : vector<16x96xf32> to vector<8x16xf32>
    %54 = vector.extract_strided_slice %32 {offsets = [8, 80], sizes = [8, 16], strides = [1, 1]} : vector<16x96xf32> to vector<8x16xf32>
    %55 = vector.shape_cast %51 : vector<8x16xf32> to vector<1x8x16xf32>
    %56 = vector.shape_cast %52 : vector<8x16xf32> to vector<1x8x16xf32>
    %57 = vector.shape_cast %53 : vector<8x16xf32> to vector<1x8x16xf32>
    %58 = vector.shape_cast %54 : vector<8x16xf32> to vector<1x8x16xf32>
    %59 = tpu.concatenate %55, %56, %57, %58 in 0 : vector<1x8x16xf32>, vector<1x8x16xf32>, vector<1x8x16xf32>, vector<1x8x16xf32> -> vector<4x8x16xf32>
    "tpu.trace_start"() <{level = 10 : i32, message = "bqd,bkd->bqk"}> : () -> ()
    %cst_19 = arith.constant dense<0.000000e+00> : vector<4x8x8xf32>
    %60 = tpu.matmul %41, %50, %cst_19 {dimension_numbers = #tpu.dot_dimension_numbers<[2], [2], [1], [1], [0, 0, 0, 1, 1, 1], [0], [0]>} : vector<4x8x16xf32>, vector<4x8x16xf32>, vector<4x8x8xf32> -> vector<4x8x8xf32>
    "tpu.trace_stop"() : () -> ()
    %61 = vector.broadcast %25 : vector<4x1x8xf32> to vector<4x8x8xf32>
    %62 = arith.addf %60, %61 : vector<4x8x8xf32>
    %cst_20 = arith.constant dense<0xFF800000> : vector<4x8xf32>
    %63 = vector.multi_reduction <maximumf>, %62, %cst_20 [2] : vector<4x8x8xf32> to vector<4x8xf32>
    %64 = vector.shape_cast %63 : vector<4x8xf32> to vector<4x8x1xf32>
    %65 = vector.broadcast %64 : vector<4x8x1xf32> to vector<4x8x8xf32>
    %66 = arith.subf %62, %65 : vector<4x8x8xf32>
    %67 = math.exp %66 : vector<4x8x8xf32>
    %cst_21 = arith.constant dense<0.000000e+00> : vector<4x8xf32>
    %68 = vector.multi_reduction <add>, %67, %cst_21 [2] : vector<4x8x8xf32> to vector<4x8xf32>
    %69 = vector.shape_cast %68 : vector<4x8xf32> to vector<4x8x1xf32>
    %70 = tpu.reciprocal %69 {approx = true} : vector<4x8x1xf32> -> vector<4x8x1xf32>
    %71 = vector.broadcast %70 : vector<4x8x1xf32> to vector<4x8x8xf32>
    %72 = arith.mulf %67, %71 : vector<4x8x8xf32>
    "tpu.trace_start"() <{level = 10 : i32, message = "bqk,bkd->bqd"}> : () -> ()
    %cst_22 = arith.constant dense<0.000000e+00> : vector<4x8x16xf32>
    %73 = tpu.matmul %72, %59, %cst_22 {dimension_numbers = #tpu.dot_dimension_numbers<[2], [1], [1], [2], [0, 0, 0, 1, 1, 2], [0], [0]>} : vector<4x8x8xf32>, vector<4x8x16xf32>, vector<4x8x16xf32> -> vector<4x8x16xf32>
    "tpu.trace_stop"() : () -> ()
    %74 = vector.shape_cast %73 : vector<4x8x16xf32> to vector<2x2x8x16xf32>
    %c0_23 = arith.constant 0 : index
    %c0_24 = arith.constant 0 : index
    %c0_25 = arith.constant 0 : index
    %75 = vector.load %arg7[%c0_23, %c0_24, %c0_25] : memref<2x32x32xf32, #tpu.memory_space<vmem>>, vector<1x32x32xf32>
    %76 = vector.shape_cast %75 : vector<1x32x32xf32> to vector<32x32xf32>
    %cst_26 = arith.constant 0.000000e+00 : f32
    %77 = vector.broadcast %cst_26 : f32 to vector<16x32xf32>
    %78 = vector.extract_strided_slice %74 {offsets = [0, 0, 0, 0], sizes = [2, 1, 8, 16], strides = [1, 1, 1, 1]} : vector<2x2x8x16xf32> to vector<2x1x8x16xf32>
    %79 = vector.shape_cast %78 : vector<2x1x8x16xf32> to vector<2x8x16xf32>
    %80 = vector.shape_cast %79 : vector<2x8x16xf32> to vector<16x16xf32>
    %81 = vector.extract_strided_slice %76 {offsets = [0, 0], sizes = [16, 32], strides = [1, 1]} : vector<32x32xf32> to vector<16x32xf32>
    %cst_27 = arith.constant dense<0.000000e+00> : vector<16x32xf32>
    %82 = tpu.matmul %80, %81, %cst_27 {dimension_numbers = #tpu.dot_dimension_numbers<[1], [0], [0], [1], [0, 0, 1, 1], [], []>} : vector<16x16xf32>, vector<16x32xf32>, vector<16x32xf32> -> vector<16x32xf32>
    %83 = arith.addf %77, %82 : vector<16x32xf32>
    %84 = vector.extract_strided_slice %74 {offsets = [0, 1, 0, 0], sizes = [2, 1, 8, 16], strides = [1, 1, 1, 1]} : vector<2x2x8x16xf32> to vector<2x1x8x16xf32>
    %85 = vector.shape_cast %84 : vector<2x1x8x16xf32> to vector<2x8x16xf32>
    %86 = vector.shape_cast %85 : vector<2x8x16xf32> to vector<16x16xf32>
    %87 = vector.extract_strided_slice %76 {offsets = [16, 0], sizes = [16, 32], strides = [1, 1]} : vector<32x32xf32> to vector<16x32xf32>
    %cst_28 = arith.constant dense<0.000000e+00> : vector<16x32xf32>
    %88 = tpu.matmul %86, %87, %cst_28 {dimension_numbers = #tpu.dot_dimension_numbers<[1], [0], [0], [1], [0, 0, 1, 1], [], []>} : vector<16x16xf32>, vector<16x32xf32>, vector<16x32xf32> -> vector<16x32xf32>
    %89 = arith.addf %83, %88 : vector<16x32xf32>
    %c0_29 = arith.constant 0 : index
    %c0_30 = arith.constant 0 : index
    %c0_31 = arith.constant 0 : index
    %90 = vector.load %arg8[%c0_29, %c0_30, %c0_31] : memref<2x1x32xf32, #tpu.memory_space<vmem>>, vector<1x1x32xf32>
    %91 = vector.shape_cast %90 : vector<1x1x32xf32> to vector<1x32xf32>
    %92 = vector.broadcast %91 : vector<1x32xf32> to vector<16x32xf32>
    %93 = arith.addf %89, %92 : vector<16x32xf32>
    %94 = arith.addf %93, %24 : vector<16x32xf32>
    %c0_32 = arith.constant 0 : index
    %c0_33 = arith.constant 0 : index
    %c0_34 = arith.constant 0 : index
    %95 = vector.load %arg9[%c0_32, %c0_33, %c0_34] : memref<2x1x32xf32, #tpu.memory_space<vmem>>, vector<1x1x32xf32>
    %96 = vector.shape_cast %95 : vector<1x1x32xf32> to vector<1x32xf32>
    %c0_35 = arith.constant 0 : index
    %c0_36 = arith.constant 0 : index
    %c0_37 = arith.constant 0 : index
    %97 = vector.load %arg10[%c0_35, %c0_36, %c0_37] : memref<2x1x32xf32, #tpu.memory_space<vmem>>, vector<1x1x32xf32>
    %98 = vector.shape_cast %97 : vector<1x1x32xf32> to vector<1x32xf32>
    %cst_38 = arith.constant dense<0.000000e+00> : vector<16xf32>
    %99 = vector.multi_reduction <add>, %94, %cst_38 [1] : vector<16x32xf32> to vector<16xf32>
    %100 = vector.shape_cast %99 : vector<16xf32> to vector<16x1xf32>
    %cst_39 = arith.constant 3.200000e+01 : f32
    %101 = vector.broadcast %cst_39 : f32 to vector<16x1xf32>
    %102 = arith.divf %100, %101 : vector<16x1xf32>
    %103 = vector.broadcast %102 : vector<16x1xf32> to vector<16x32xf32>
    %104 = arith.subf %94, %103 : vector<16x32xf32>
    %105 = arith.mulf %104, %104 : vector<16x32xf32>
    %cst_40 = arith.constant dense<0.000000e+00> : vector<16xf32>
    %106 = vector.multi_reduction <add>, %105, %cst_40 [1] : vector<16x32xf32> to vector<16xf32>
    %107 = vector.shape_cast %106 : vector<16xf32> to vector<16x1xf32>
    %cst_41 = arith.constant 3.200000e+01 : f32
    %108 = vector.broadcast %cst_41 : f32 to vector<16x1xf32>
    %109 = arith.divf %107, %108 : vector<16x1xf32>
    %110 = vector.broadcast %102 : vector<16x1xf32> to vector<16x32xf32>
    %111 = arith.subf %94, %110 : vector<16x32xf32>
    %cst_42 = arith.constant 9.99999996E-13 : f32
    %112 = vector.broadcast %cst_42 : f32 to vector<16x1xf32>
    %113 = arith.addf %109, %112 : vector<16x1xf32>
    %114 = math.rsqrt %113 : vector<16x1xf32>
    %115 = vector.broadcast %114 : vector<16x1xf32> to vector<16x32xf32>
    %116 = arith.mulf %111, %115 : vector<16x32xf32>
    %117 = vector.broadcast %96 : vector<1x32xf32> to vector<16x32xf32>
    %118 = arith.mulf %116, %117 : vector<16x32xf32>
    %119 = vector.broadcast %98 : vector<1x32xf32> to vector<16x32xf32>
    %120 = arith.addf %118, %119 : vector<16x32xf32>
    %c0_43 = arith.constant 0 : index
    %c0_44 = arith.constant 0 : index
    %c0_45 = arith.constant 0 : index
    %121 = vector.load %arg11[%c0_43, %c0_44, %c0_45] : memref<2x32x64xf32, #tpu.memory_space<vmem>>, vector<1x32x64xf32>
    %122 = vector.shape_cast %121 : vector<1x32x64xf32> to vector<32x64xf32>
    %cst_46 = arith.constant dense<0.000000e+00> : vector<16x64xf32>
    %123 = tpu.matmul %120, %122, %cst_46 {dimension_numbers = #tpu.dot_dimension_numbers<[1], [0], [0], [1], [0, 0, 1, 1], [], []>} : vector<16x32xf32>, vector<32x64xf32>, vector<16x64xf32> -> vector<16x64xf32>
    %c0_47 = arith.constant 0 : index
    %c0_48 = arith.constant 0 : index
    %c0_49 = arith.constant 0 : index
    %124 = vector.load %arg12[%c0_47, %c0_48, %c0_49] : memref<2x1x64xf32, #tpu.memory_space<vmem>>, vector<1x1x64xf32>
    %125 = vector.shape_cast %124 : vector<1x1x64xf32> to vector<1x64xf32>
    %126 = vector.broadcast %125 : vector<1x64xf32> to vector<16x64xf32>
    %127 = arith.addf %123, %126 : vector<16x64xf32>
    %128 = arith.mulf %127, %127 : vector<16x64xf32>
    %129 = arith.mulf %127, %128 : vector<16x64xf32>
    %cst_50 = arith.constant 4.471500e-02 : f32
    %130 = vector.broadcast %cst_50 : f32 to vector<16x64xf32>
    %131 = arith.mulf %130, %129 : vector<16x64xf32>
    %132 = arith.addf %127, %131 : vector<16x64xf32>
    %cst_51 = arith.constant 0.797884583 : f32
    %133 = vector.broadcast %cst_51 : f32 to vector<16x64xf32>
    %134 = arith.mulf %133, %132 : vector<16x64xf32>
    %135 = math.tanh %134 : vector<16x64xf32>
    %cst_52 = arith.constant 1.000000e+00 : f32
    %136 = vector.broadcast %cst_52 : f32 to vector<16x64xf32>
    %137 = arith.addf %136, %135 : vector<16x64xf32>
    %cst_53 = arith.constant 5.000000e-01 : f32
    %138 = vector.broadcast %cst_53 : f32 to vector<16x64xf32>
    %139 = arith.mulf %138, %137 : vector<16x64xf32>
    %140 = arith.mulf %127, %139 : vector<16x64xf32>
    %c0_54 = arith.constant 0 : index
    %c0_55 = arith.constant 0 : index
    %c0_56 = arith.constant 0 : index
    %141 = vector.load %arg13[%c0_54, %c0_55, %c0_56] : memref<2x64x32xf32, #tpu.memory_space<vmem>>, vector<1x64x32xf32>
    %142 = vector.shape_cast %141 : vector<1x64x32xf32> to vector<64x32xf32>
    %cst_57 = arith.constant dense<0.000000e+00> : vector<16x32xf32>
    %143 = tpu.matmul %140, %142, %cst_57 {dimension_numbers = #tpu.dot_dimension_numbers<[1], [0], [0], [1], [0, 0, 1, 1], [], []>} : vector<16x64xf32>, vector<64x32xf32>, vector<16x32xf32> -> vector<16x32xf32>
    %c0_58 = arith.constant 0 : index
    %c0_59 = arith.constant 0 : index
    %c0_60 = arith.constant 0 : index
    %144 = vector.load %arg14[%c0_58, %c0_59, %c0_60] : memref<2x1x32xf32, #tpu.memory_space<vmem>>, vector<1x1x32xf32>
    %145 = vector.shape_cast %144 : vector<1x1x32xf32> to vector<1x32xf32>
    %146 = vector.broadcast %145 : vector<1x32xf32> to vector<16x32xf32>
    %147 = arith.addf %143, %146 : vector<16x32xf32>
    %148 = arith.addf %147, %120 : vector<16x32xf32>
    %c0_61 = arith.constant 0 : index
    %c0_62 = arith.constant 0 : index
    %c0_63 = arith.constant 0 : index
    %149 = vector.load %arg15[%c0_61, %c0_62, %c0_63] : memref<2x1x32xf32, #tpu.memory_space<vmem>>, vector<1x1x32xf32>
    %150 = vector.shape_cast %149 : vector<1x1x32xf32> to vector<1x32xf32>
    %c0_64 = arith.constant 0 : index
    %c0_65 = arith.constant 0 : index
    %c0_66 = arith.constant 0 : index
    %151 = vector.load %arg16[%c0_64, %c0_65, %c0_66] : memref<2x1x32xf32, #tpu.memory_space<vmem>>, vector<1x1x32xf32>
    %152 = vector.shape_cast %151 : vector<1x1x32xf32> to vector<1x32xf32>
    %cst_67 = arith.constant dense<0.000000e+00> : vector<16xf32>
    %153 = vector.multi_reduction <add>, %148, %cst_67 [1] : vector<16x32xf32> to vector<16xf32>
    %154 = vector.shape_cast %153 : vector<16xf32> to vector<16x1xf32>
    %cst_68 = arith.constant 3.200000e+01 : f32
    %155 = vector.broadcast %cst_68 : f32 to vector<16x1xf32>
    %156 = arith.divf %154, %155 : vector<16x1xf32>
    %157 = vector.broadcast %156 : vector<16x1xf32> to vector<16x32xf32>
    %158 = arith.subf %148, %157 : vector<16x32xf32>
    %159 = arith.mulf %158, %158 : vector<16x32xf32>
    %cst_69 = arith.constant dense<0.000000e+00> : vector<16xf32>
    %160 = vector.multi_reduction <add>, %159, %cst_69 [1] : vector<16x32xf32> to vector<16xf32>
    %161 = vector.shape_cast %160 : vector<16xf32> to vector<16x1xf32>
    %cst_70 = arith.constant 3.200000e+01 : f32
    %162 = vector.broadcast %cst_70 : f32 to vector<16x1xf32>
    %163 = arith.divf %161, %162 : vector<16x1xf32>
    %164 = vector.broadcast %156 : vector<16x1xf32> to vector<16x32xf32>
    %165 = arith.subf %148, %164 : vector<16x32xf32>
    %cst_71 = arith.constant 9.99999996E-13 : f32
    %166 = vector.broadcast %cst_71 : f32 to vector<16x1xf32>
    %167 = arith.addf %163, %166 : vector<16x1xf32>
    %168 = math.rsqrt %167 : vector<16x1xf32>
    %169 = vector.broadcast %168 : vector<16x1xf32> to vector<16x32xf32>
    %170 = arith.mulf %165, %169 : vector<16x32xf32>
    %171 = vector.broadcast %150 : vector<1x32xf32> to vector<16x32xf32>
    %172 = arith.mulf %170, %171 : vector<16x32xf32>
    %173 = vector.broadcast %152 : vector<1x32xf32> to vector<16x32xf32>
    %174 = arith.addf %172, %173 : vector<16x32xf32>
    %c1 = arith.constant 1 : index
    %c0_72 = arith.constant 0 : index
    %c0_73 = arith.constant 0 : index
    %175 = vector.load %arg5[%c1, %c0_72, %c0_73] : memref<2x32x96xf32, #tpu.memory_space<vmem>>, vector<1x32x96xf32>
    %176 = vector.shape_cast %175 : vector<1x32x96xf32> to vector<32x96xf32>
    %cst_74 = arith.constant dense<0.000000e+00> : vector<16x96xf32>
    %177 = tpu.matmul %174, %176, %cst_74 {dimension_numbers = #tpu.dot_dimension_numbers<[1], [0], [0], [1], [0, 0, 1, 1], [], []>} : vector<16x32xf32>, vector<32x96xf32>, vector<16x96xf32> -> vector<16x96xf32>
    %c1_75 = arith.constant 1 : index
    %c0_76 = arith.constant 0 : index
    %c0_77 = arith.constant 0 : index
    %178 = vector.load %arg6[%c1_75, %c0_76, %c0_77] : memref<2x1x96xf32, #tpu.memory_space<vmem>>, vector<1x1x96xf32>
    %179 = vector.shape_cast %178 : vector<1x1x96xf32> to vector<1x96xf32>
    %180 = vector.broadcast %179 : vector<1x96xf32> to vector<16x96xf32>
    %181 = arith.addf %177, %180 : vector<16x96xf32>
    %182 = vector.extract_strided_slice %181 {offsets = [0, 0], sizes = [8, 16], strides = [1, 1]} : vector<16x96xf32> to vector<8x16xf32>
    %183 = vector.extract_strided_slice %181 {offsets = [0, 16], sizes = [8, 16], strides = [1, 1]} : vector<16x96xf32> to vector<8x16xf32>
    %184 = vector.extract_strided_slice %181 {offsets = [8, 0], sizes = [8, 16], strides = [1, 1]} : vector<16x96xf32> to vector<8x16xf32>
    %185 = vector.extract_strided_slice %181 {offsets = [8, 16], sizes = [8, 16], strides = [1, 1]} : vector<16x96xf32> to vector<8x16xf32>
    %186 = vector.shape_cast %182 : vector<8x16xf32> to vector<1x8x16xf32>
    %187 = vector.shape_cast %183 : vector<8x16xf32> to vector<1x8x16xf32>
    %188 = vector.shape_cast %184 : vector<8x16xf32> to vector<1x8x16xf32>
    %189 = vector.shape_cast %185 : vector<8x16xf32> to vector<1x8x16xf32>
    %190 = tpu.concatenate %186, %187, %188, %189 in 0 : vector<1x8x16xf32>, vector<1x8x16xf32>, vector<1x8x16xf32>, vector<1x8x16xf32> -> vector<4x8x16xf32>
    %191 = vector.extract_strided_slice %181 {offsets = [0, 32], sizes = [8, 16], strides = [1, 1]} : vector<16x96xf32> to vector<8x16xf32>
    %192 = vector.extract_strided_slice %181 {offsets = [0, 48], sizes = [8, 16], strides = [1, 1]} : vector<16x96xf32> to vector<8x16xf32>
    %193 = vector.extract_strided_slice %181 {offsets = [8, 32], sizes = [8, 16], strides = [1, 1]} : vector<16x96xf32> to vector<8x16xf32>
    %194 = vector.extract_strided_slice %181 {offsets = [8, 48], sizes = [8, 16], strides = [1, 1]} : vector<16x96xf32> to vector<8x16xf32>
    %195 = vector.shape_cast %191 : vector<8x16xf32> to vector<1x8x16xf32>
    %196 = vector.shape_cast %192 : vector<8x16xf32> to vector<1x8x16xf32>
    %197 = vector.shape_cast %193 : vector<8x16xf32> to vector<1x8x16xf32>
    %198 = vector.shape_cast %194 : vector<8x16xf32> to vector<1x8x16xf32>
    %199 = tpu.concatenate %195, %196, %197, %198 in 0 : vector<1x8x16xf32>, vector<1x8x16xf32>, vector<1x8x16xf32>, vector<1x8x16xf32> -> vector<4x8x16xf32>
    %200 = vector.extract_strided_slice %181 {offsets = [0, 64], sizes = [8, 16], strides = [1, 1]} : vector<16x96xf32> to vector<8x16xf32>
    %201 = vector.extract_strided_slice %181 {offsets = [0, 80], sizes = [8, 16], strides = [1, 1]} : vector<16x96xf32> to vector<8x16xf32>
    %202 = vector.extract_strided_slice %181 {offsets = [8, 64], sizes = [8, 16], strides = [1, 1]} : vector<16x96xf32> to vector<8x16xf32>
    %203 = vector.extract_strided_slice %181 {offsets = [8, 80], sizes = [8, 16], strides = [1, 1]} : vector<16x96xf32> to vector<8x16xf32>
    %204 = vector.shape_cast %200 : vector<8x16xf32> to vector<1x8x16xf32>
    %205 = vector.shape_cast %201 : vector<8x16xf32> to vector<1x8x16xf32>
    %206 = vector.shape_cast %202 : vector<8x16xf32> to vector<1x8x16xf32>
    %207 = vector.shape_cast %203 : vector<8x16xf32> to vector<1x8x16xf32>
    %208 = tpu.concatenate %204, %205, %206, %207 in 0 : vector<1x8x16xf32>, vector<1x8x16xf32>, vector<1x8x16xf32>, vector<1x8x16xf32> -> vector<4x8x16xf32>
    "tpu.trace_start"() <{level = 10 : i32, message = "bqd,bkd->bqk"}> : () -> ()
    %cst_78 = arith.constant dense<0.000000e+00> : vector<4x8x8xf32>
    %209 = tpu.matmul %190, %199, %cst_78 {dimension_numbers = #tpu.dot_dimension_numbers<[2], [2], [1], [1], [0, 0, 0, 1, 1, 1], [0], [0]>} : vector<4x8x16xf32>, vector<4x8x16xf32>, vector<4x8x8xf32> -> vector<4x8x8xf32>
    "tpu.trace_stop"() : () -> ()
    %210 = vector.broadcast %25 : vector<4x1x8xf32> to vector<4x8x8xf32>
    %211 = arith.addf %209, %210 : vector<4x8x8xf32>
    %cst_79 = arith.constant dense<0xFF800000> : vector<4x8xf32>
    %212 = vector.multi_reduction <maximumf>, %211, %cst_79 [2] : vector<4x8x8xf32> to vector<4x8xf32>
    %213 = vector.shape_cast %212 : vector<4x8xf32> to vector<4x8x1xf32>
    %214 = vector.broadcast %213 : vector<4x8x1xf32> to vector<4x8x8xf32>
    %215 = arith.subf %211, %214 : vector<4x8x8xf32>
    %216 = math.exp %215 : vector<4x8x8xf32>
    %cst_80 = arith.constant dense<0.000000e+00> : vector<4x8xf32>
    %217 = vector.multi_reduction <add>, %216, %cst_80 [2] : vector<4x8x8xf32> to vector<4x8xf32>
    %218 = vector.shape_cast %217 : vector<4x8xf32> to vector<4x8x1xf32>
    %219 = tpu.reciprocal %218 {approx = true} : vector<4x8x1xf32> -> vector<4x8x1xf32>
    %220 = vector.broadcast %219 : vector<4x8x1xf32> to vector<4x8x8xf32>
    %221 = arith.mulf %216, %220 : vector<4x8x8xf32>
    "tpu.trace_start"() <{level = 10 : i32, message = "bqk,bkd->bqd"}> : () -> ()
    %cst_81 = arith.constant dense<0.000000e+00> : vector<4x8x16xf32>
    %222 = tpu.matmul %221, %208, %cst_81 {dimension_numbers = #tpu.dot_dimension_numbers<[2], [1], [1], [2], [0, 0, 0, 1, 1, 2], [0], [0]>} : vector<4x8x8xf32>, vector<4x8x16xf32>, vector<4x8x16xf32> -> vector<4x8x16xf32>
    "tpu.trace_stop"() : () -> ()
    %223 = vector.shape_cast %222 : vector<4x8x16xf32> to vector<2x2x8x16xf32>
    %c1_82 = arith.constant 1 : index
    %c0_83 = arith.constant 0 : index
    %c0_84 = arith.constant 0 : index
    %224 = vector.load %arg7[%c1_82, %c0_83, %c0_84] : memref<2x32x32xf32, #tpu.memory_space<vmem>>, vector<1x32x32xf32>
    %225 = vector.shape_cast %224 : vector<1x32x32xf32> to vector<32x32xf32>
    %cst_85 = arith.constant 0.000000e+00 : f32
    %226 = vector.broadcast %cst_85 : f32 to vector<16x32xf32>
    %227 = vector.extract_strided_slice %223 {offsets = [0, 0, 0, 0], sizes = [2, 1, 8, 16], strides = [1, 1, 1, 1]} : vector<2x2x8x16xf32> to vector<2x1x8x16xf32>
    %228 = vector.shape_cast %227 : vector<2x1x8x16xf32> to vector<2x8x16xf32>
    %229 = vector.shape_cast %228 : vector<2x8x16xf32> to vector<16x16xf32>
    %230 = vector.extract_strided_slice %225 {offsets = [0, 0], sizes = [16, 32], strides = [1, 1]} : vector<32x32xf32> to vector<16x32xf32>
    %cst_86 = arith.constant dense<0.000000e+00> : vector<16x32xf32>
    %231 = tpu.matmul %229, %230, %cst_86 {dimension_numbers = #tpu.dot_dimension_numbers<[1], [0], [0], [1], [0, 0, 1, 1], [], []>} : vector<16x16xf32>, vector<16x32xf32>, vector<16x32xf32> -> vector<16x32xf32>
    %232 = arith.addf %226, %231 : vector<16x32xf32>
    %233 = vector.extract_strided_slice %223 {offsets = [0, 1, 0, 0], sizes = [2, 1, 8, 16], strides = [1, 1, 1, 1]} : vector<2x2x8x16xf32> to vector<2x1x8x16xf32>
    %234 = vector.shape_cast %233 : vector<2x1x8x16xf32> to vector<2x8x16xf32>
    %235 = vector.shape_cast %234 : vector<2x8x16xf32> to vector<16x16xf32>
    %236 = vector.extract_strided_slice %225 {offsets = [16, 0], sizes = [16, 32], strides = [1, 1]} : vector<32x32xf32> to vector<16x32xf32>
    %cst_87 = arith.constant dense<0.000000e+00> : vector<16x32xf32>
    %237 = tpu.matmul %235, %236, %cst_87 {dimension_numbers = #tpu.dot_dimension_numbers<[1], [0], [0], [1], [0, 0, 1, 1], [], []>} : vector<16x16xf32>, vector<16x32xf32>, vector<16x32xf32> -> vector<16x32xf32>
    %238 = arith.addf %232, %237 : vector<16x32xf32>
    %c1_88 = arith.constant 1 : index
    %c0_89 = arith.constant 0 : index
    %c0_90 = arith.constant 0 : index
    %239 = vector.load %arg8[%c1_88, %c0_89, %c0_90] : memref<2x1x32xf32, #tpu.memory_space<vmem>>, vector<1x1x32xf32>
    %240 = vector.shape_cast %239 : vector<1x1x32xf32> to vector<1x32xf32>
    %241 = vector.broadcast %240 : vector<1x32xf32> to vector<16x32xf32>
    %242 = arith.addf %238, %241 : vector<16x32xf32>
    %243 = arith.addf %242, %174 : vector<16x32xf32>
    %c1_91 = arith.constant 1 : index
    %c0_92 = arith.constant 0 : index
    %c0_93 = arith.constant 0 : index
    %244 = vector.load %arg9[%c1_91, %c0_92, %c0_93] : memref<2x1x32xf32, #tpu.memory_space<vmem>>, vector<1x1x32xf32>
    %245 = vector.shape_cast %244 : vector<1x1x32xf32> to vector<1x32xf32>
    %c1_94 = arith.constant 1 : index
    %c0_95 = arith.constant 0 : index
    %c0_96 = arith.constant 0 : index
    %246 = vector.load %arg10[%c1_94, %c0_95, %c0_96] : memref<2x1x32xf32, #tpu.memory_space<vmem>>, vector<1x1x32xf32>
    %247 = vector.shape_cast %246 : vector<1x1x32xf32> to vector<1x32xf32>
    %cst_97 = arith.constant dense<0.000000e+00> : vector<16xf32>
    %248 = vector.multi_reduction <add>, %243, %cst_97 [1] : vector<16x32xf32> to vector<16xf32>
    %249 = vector.shape_cast %248 : vector<16xf32> to vector<16x1xf32>
    %cst_98 = arith.constant 3.200000e+01 : f32
    %250 = vector.broadcast %cst_98 : f32 to vector<16x1xf32>
    %251 = arith.divf %249, %250 : vector<16x1xf32>
    %252 = vector.broadcast %251 : vector<16x1xf32> to vector<16x32xf32>
    %253 = arith.subf %243, %252 : vector<16x32xf32>
    %254 = arith.mulf %253, %253 : vector<16x32xf32>
    %cst_99 = arith.constant dense<0.000000e+00> : vector<16xf32>
    %255 = vector.multi_reduction <add>, %254, %cst_99 [1] : vector<16x32xf32> to vector<16xf32>
    %256 = vector.shape_cast %255 : vector<16xf32> to vector<16x1xf32>
    %cst_100 = arith.constant 3.200000e+01 : f32
    %257 = vector.broadcast %cst_100 : f32 to vector<16x1xf32>
    %258 = arith.divf %256, %257 : vector<16x1xf32>
    %259 = vector.broadcast %251 : vector<16x1xf32> to vector<16x32xf32>
    %260 = arith.subf %243, %259 : vector<16x32xf32>
    %cst_101 = arith.constant 9.99999996E-13 : f32
    %261 = vector.broadcast %cst_101 : f32 to vector<16x1xf32>
    %262 = arith.addf %258, %261 : vector<16x1xf32>
    %263 = math.rsqrt %262 : vector<16x1xf32>
    %264 = vector.broadcast %263 : vector<16x1xf32> to vector<16x32xf32>
    %265 = arith.mulf %260, %264 : vector<16x32xf32>
    %266 = vector.broadcast %245 : vector<1x32xf32> to vector<16x32xf32>
    %267 = arith.mulf %265, %266 : vector<16x32xf32>
    %268 = vector.broadcast %247 : vector<1x32xf32> to vector<16x32xf32>
    %269 = arith.addf %267, %268 : vector<16x32xf32>
    %c1_102 = arith.constant 1 : index
    %c0_103 = arith.constant 0 : index
    %c0_104 = arith.constant 0 : index
    %270 = vector.load %arg11[%c1_102, %c0_103, %c0_104] : memref<2x32x64xf32, #tpu.memory_space<vmem>>, vector<1x32x64xf32>
    %271 = vector.shape_cast %270 : vector<1x32x64xf32> to vector<32x64xf32>
    %cst_105 = arith.constant dense<0.000000e+00> : vector<16x64xf32>
    %272 = tpu.matmul %269, %271, %cst_105 {dimension_numbers = #tpu.dot_dimension_numbers<[1], [0], [0], [1], [0, 0, 1, 1], [], []>} : vector<16x32xf32>, vector<32x64xf32>, vector<16x64xf32> -> vector<16x64xf32>
    %c1_106 = arith.constant 1 : index
    %c0_107 = arith.constant 0 : index
    %c0_108 = arith.constant 0 : index
    %273 = vector.load %arg12[%c1_106, %c0_107, %c0_108] : memref<2x1x64xf32, #tpu.memory_space<vmem>>, vector<1x1x64xf32>
    %274 = vector.shape_cast %273 : vector<1x1x64xf32> to vector<1x64xf32>
    %275 = vector.broadcast %274 : vector<1x64xf32> to vector<16x64xf32>
    %276 = arith.addf %272, %275 : vector<16x64xf32>
    %277 = arith.mulf %276, %276 : vector<16x64xf32>
    %278 = arith.mulf %276, %277 : vector<16x64xf32>
    %cst_109 = arith.constant 4.471500e-02 : f32
    %279 = vector.broadcast %cst_109 : f32 to vector<16x64xf32>
    %280 = arith.mulf %279, %278 : vector<16x64xf32>
    %281 = arith.addf %276, %280 : vector<16x64xf32>
    %cst_110 = arith.constant 0.797884583 : f32
    %282 = vector.broadcast %cst_110 : f32 to vector<16x64xf32>
    %283 = arith.mulf %282, %281 : vector<16x64xf32>
    %284 = math.tanh %283 : vector<16x64xf32>
    %cst_111 = arith.constant 1.000000e+00 : f32
    %285 = vector.broadcast %cst_111 : f32 to vector<16x64xf32>
    %286 = arith.addf %285, %284 : vector<16x64xf32>
    %cst_112 = arith.constant 5.000000e-01 : f32
    %287 = vector.broadcast %cst_112 : f32 to vector<16x64xf32>
    %288 = arith.mulf %287, %286 : vector<16x64xf32>
    %289 = arith.mulf %276, %288 : vector<16x64xf32>
    %c1_113 = arith.constant 1 : index
    %c0_114 = arith.constant 0 : index
    %c0_115 = arith.constant 0 : index
    %290 = vector.load %arg13[%c1_113, %c0_114, %c0_115] : memref<2x64x32xf32, #tpu.memory_space<vmem>>, vector<1x64x32xf32>
    %291 = vector.shape_cast %290 : vector<1x64x32xf32> to vector<64x32xf32>
    %cst_116 = arith.constant dense<0.000000e+00> : vector<16x32xf32>
    %292 = tpu.matmul %289, %291, %cst_116 {dimension_numbers = #tpu.dot_dimension_numbers<[1], [0], [0], [1], [0, 0, 1, 1], [], []>} : vector<16x64xf32>, vector<64x32xf32>, vector<16x32xf32> -> vector<16x32xf32>
    %c1_117 = arith.constant 1 : index
    %c0_118 = arith.constant 0 : index
    %c0_119 = arith.constant 0 : index
    %293 = vector.load %arg14[%c1_117, %c0_118, %c0_119] : memref<2x1x32xf32, #tpu.memory_space<vmem>>, vector<1x1x32xf32>
    %294 = vector.shape_cast %293 : vector<1x1x32xf32> to vector<1x32xf32>
    %295 = vector.broadcast %294 : vector<1x32xf32> to vector<16x32xf32>
    %296 = arith.addf %292, %295 : vector<16x32xf32>
    %297 = arith.addf %296, %269 : vector<16x32xf32>
    %c1_120 = arith.constant 1 : index
    %c0_121 = arith.constant 0 : index
    %c0_122 = arith.constant 0 : index
    %298 = vector.load %arg15[%c1_120, %c0_121, %c0_122] : memref<2x1x32xf32, #tpu.memory_space<vmem>>, vector<1x1x32xf32>
    %299 = vector.shape_cast %298 : vector<1x1x32xf32> to vector<1x32xf32>
    %c1_123 = arith.constant 1 : index
    %c0_124 = arith.constant 0 : index
    %c0_125 = arith.constant 0 : index
    %300 = vector.load %arg16[%c1_123, %c0_124, %c0_125] : memref<2x1x32xf32, #tpu.memory_space<vmem>>, vector<1x1x32xf32>
    %301 = vector.shape_cast %300 : vector<1x1x32xf32> to vector<1x32xf32>
    %cst_126 = arith.constant dense<0.000000e+00> : vector<16xf32>
    %302 = vector.multi_reduction <add>, %297, %cst_126 [1] : vector<16x32xf32> to vector<16xf32>
    %303 = vector.shape_cast %302 : vector<16xf32> to vector<16x1xf32>
    %cst_127 = arith.constant 3.200000e+01 : f32
    %304 = vector.broadcast %cst_127 : f32 to vector<16x1xf32>
    %305 = arith.divf %303, %304 : vector<16x1xf32>
    %306 = vector.broadcast %305 : vector<16x1xf32> to vector<16x32xf32>
    %307 = arith.subf %297, %306 : vector<16x32xf32>
    %308 = arith.mulf %307, %307 : vector<16x32xf32>
    %cst_128 = arith.constant dense<0.000000e+00> : vector<16xf32>
    %309 = vector.multi_reduction <add>, %308, %cst_128 [1] : vector<16x32xf32> to vector<16xf32>
    %310 = vector.shape_cast %309 : vector<16xf32> to vector<16x1xf32>
    %cst_129 = arith.constant 3.200000e+01 : f32
    %311 = vector.broadcast %cst_129 : f32 to vector<16x1xf32>
    %312 = arith.divf %310, %311 : vector<16x1xf32>
    %313 = vector.broadcast %305 : vector<16x1xf32> to vector<16x32xf32>
    %314 = arith.subf %297, %313 : vector<16x32xf32>
    %cst_130 = arith.constant 9.99999996E-13 : f32
    %315 = vector.broadcast %cst_130 : f32 to vector<16x1xf32>
    %316 = arith.addf %312, %315 : vector<16x1xf32>
    %317 = math.rsqrt %316 : vector<16x1xf32>
    %318 = vector.broadcast %317 : vector<16x1xf32> to vector<16x32xf32>
    %319 = arith.mulf %314, %318 : vector<16x32xf32>
    %320 = vector.broadcast %299 : vector<1x32xf32> to vector<16x32xf32>
    %321 = arith.mulf %319, %320 : vector<16x32xf32>
    %322 = vector.broadcast %301 : vector<1x32xf32> to vector<16x32xf32>
    %323 = arith.addf %321, %322 : vector<16x32xf32>
    %324 = vector.shape_cast %323 : vector<16x32xf32> to vector<2x8x32xf32>
    %325 = vector.extract_strided_slice %324 {offsets = [0, 0, 0], sizes = [2, 1, 32], strides = [1, 1, 1]} : vector<2x8x32xf32> to vector<2x1x32xf32>
    %326 = vector.shape_cast %325 : vector<2x1x32xf32> to vector<2x32xf32>
    %c0_131 = arith.constant 0 : index
    %c0_132 = arith.constant 0 : index
    %327 = vector.load %arg17[%c0_131, %c0_132] : memref<32x32xf32, #tpu.memory_space<vmem>>, vector<32x32xf32>
    %cst_133 = arith.constant dense<0.000000e+00> : vector<2x32xf32>
    %328 = tpu.matmul %326, %327, %cst_133 {dimension_numbers = #tpu.dot_dimension_numbers<[1], [0], [0], [1], [0, 0, 1, 1], [], []>} : vector<2x32xf32>, vector<32x32xf32>, vector<2x32xf32> -> vector<2x32xf32>
    %c0_134 = arith.constant 0 : index
    %c0_135 = arith.constant 0 : index
    %329 = vector.load %arg18[%c0_134, %c0_135] : memref<1x32xf32, #tpu.memory_space<vmem>>, vector<1x32xf32>
    %330 = vector.broadcast %329 : vector<1x32xf32> to vector<2x32xf32>
    %331 = arith.addf %328, %330 : vector<2x32xf32>
    %332 = math.tanh %331 : vector<2x32xf32>
    %c0_136 = arith.constant 0 : index
    %c0_137 = arith.constant 0 : index
    %333 = vector.load %arg19[%c0_136, %c0_137] : memref<32x4xf32, #tpu.memory_space<vmem>>, vector<32x4xf32>
    %cst_138 = arith.constant dense<0.000000e+00> : vector<2x4xf32>
    %334 = tpu.matmul %332, %333, %cst_138 {dimension_numbers = #tpu.dot_dimension_numbers<[1], [0], [0], [1], [0, 0, 1, 1], [], []>} : vector<2x32xf32>, vector<32x4xf32>, vector<2x4xf32> -> vector<2x4xf32>
    %c0_139 = arith.constant 0 : index
    %c0_140 = arith.constant 0 : index
    %335 = vector.load %arg20[%c0_139, %c0_140] : memref<1x4xf32, #tpu.memory_space<vmem>>, vector<1x4xf32>
    %336 = vector.broadcast %335 : vector<1x4xf32> to vector<2x4xf32>
    %337 = arith.addf %334, %336 : vector<2x4xf32>
    %338 = tpu.iota {dimensions = array<i32: 1>} : vector<2x4xi32>
    %cst_141 = arith.constant dense<0xFF800000> : vector<2xf32>
    %339 = vector.multi_reduction <maximumf>, %337, %cst_141 [1] : vector<2x4xf32> to vector<2xf32>
    %340 = vector.shape_cast %339 : vector<2xf32> to vector<2x1xf32>
    %341 = vector.broadcast %340 : vector<2x1xf32> to vector<2x4xf32>
    %342 = arith.cmpf oeq, %337, %341 : vector<2x4xf32>
    %c4_i32 = arith.constant 4 : i32
    %343 = vector.broadcast %c4_i32 : i32 to vector<2x4xi32>
    %344 = arith.select %342, %338, %343 : vector<2x4xi1>, vector<2x4xi32>
    %cst_142 = arith.constant dense<2147483647> : vector<2xi32>
    %345 = vector.multi_reduction <minsi>, %344, %cst_142 [1] : vector<2x4xi32> to vector<2xi32>
    %346 = vector.shape_cast %345 : vector<2xi32> to vector<2x1xi32>
    %c0_143 = arith.constant 0 : index
    %c0_144 = arith.constant 0 : index
    %347 = vector.load %arg21[%c0_143, %c0_144] : memref<2x1xi32, #tpu.memory_space<vmem>>, vector<2x1xi32>
    tpu.vector_store %arg21[%c0_143, %c0_144], %346 {strides = array<i32>} : memref<2x1xi32, #tpu.memory_space<vmem>>, vector<2x1xi32>,
    %348 = tpu.iota {dimensions = array<i32: 1>} : vector<1x4xi32>
    %cst_145 = arith.constant 0.000000e+00 : f32
    %349 = vector.broadcast %cst_145 : f32 to vector<1x1xf32>
    %cst_146 = arith.constant 0.000000e+00 : f32
    %350 = vector.broadcast %cst_146 : f32 to vector<1x1xf32>
    %c0_147 = arith.constant 0 : index
    %351 = memref.load %arg2[%c0_147] : memref<2xi32, #tpu.memory_space<smem>>
    %352 = vector.extract_strided_slice %337 {offsets = [0, 0], sizes = [1, 4], strides = [1, 1]} : vector<2x4xf32> to vector<1x4xf32>
    %cst_148 = arith.constant dense<0xFF800000> : vector<1xf32>
    %353 = vector.multi_reduction <maximumf>, %352, %cst_148 [1] : vector<1x4xf32> to vector<1xf32>
    %354 = vector.shape_cast %353 : vector<1xf32> to vector<1x1xf32>
    %355 = vector.broadcast %354 : vector<1x1xf32> to vector<1x4xf32>
    %356 = arith.subf %352, %355 : vector<1x4xf32>
    %357 = math.exp %356 : vector<1x4xf32>
    %cst_149 = arith.constant dense<0.000000e+00> : vector<1xf32>
    %358 = vector.multi_reduction <add>, %357, %cst_149 [1] : vector<1x4xf32> to vector<1xf32>
    %359 = vector.shape_cast %358 : vector<1xf32> to vector<1x1xf32>
    %360 = math.log %359 : vector<1x1xf32>
    %361 = arith.addf %354, %360 : vector<1x1xf32>
    %362 = vector.broadcast %351 : i32 to vector<1x4xi32>
    %363 = arith.cmpi eq, %348, %362 : vector<1x4xi32>
    %cst_150 = arith.constant 0.000000e+00 : f32
    %364 = vector.broadcast %cst_150 : f32 to vector<1x4xf32>
    %365 = arith.select %363, %352, %364 : vector<1x4xi1>, vector<1x4xf32>
    %cst_151 = arith.constant dense<0.000000e+00> : vector<1xf32>
    %366 = vector.multi_reduction <add>, %365, %cst_151 [1] : vector<1x4xf32> to vector<1xf32>
    %367 = vector.shape_cast %366 : vector<1xf32> to vector<1x1xf32>
    %c-1_i32 = arith.constant -1 : i32
    %368 = arith.cmpi ne, %351, %c-1_i32 : i32
    %369 = arith.extui %368 : i1 to i32
    %370 = arith.sitofp %369 : i32 to f32
    %371 = arith.subf %361, %367 : vector<1x1xf32>
    %372 = vector.broadcast %370 : f32 to vector<1x1xf32>
    %373 = arith.mulf %371, %372 : vector<1x1xf32>
    %374 = arith.addf %349, %373 : vector<1x1xf32>
    %375 = vector.broadcast %370 : f32 to vector<1x1xf32>
    %376 = arith.addf %350, %375 : vector<1x1xf32>
    %c1_152 = arith.constant 1 : index
    %377 = memref.load %arg2[%c1_152] : memref<2xi32, #tpu.memory_space<smem>>
    %378 = vector.extract_strided_slice %337 {offsets = [1, 0], sizes = [1, 4], strides = [1, 1]} : vector<2x4xf32> to vector<1x4xf32>
    %cst_153 = arith.constant dense<0xFF800000> : vector<1xf32>
    %379 = vector.multi_reduction <maximumf>, %378, %cst_153 [1] : vector<1x4xf32> to vector<1xf32>
    %380 = vector.shape_cast %379 : vector<1xf32> to vector<1x1xf32>
    %381 = vector.broadcast %380 : vector<1x1xf32> to vector<1x4xf32>
    %382 = arith.subf %378, %381 : vector<1x4xf32>
    %383 = math.exp %382 : vector<1x4xf32>
    %cst_154 = arith.constant dense<0.000000e+00> : vector<1xf32>
    %384 = vector.multi_reduction <add>, %383, %cst_154 [1] : vector<1x4xf32> to vector<1xf32>
    %385 = vector.shape_cast %384 : vector<1xf32> to vector<1x1xf32>
    %386 = math.log %385 : vector<1x1xf32>
    %387 = arith.addf %380, %386 : vector<1x1xf32>
    %388 = vector.broadcast %377 : i32 to vector<1x4xi32>
    %389 = arith.cmpi eq, %348, %388 : vector<1x4xi32>
    %cst_155 = arith.constant 0.000000e+00 : f32
    %390 = vector.broadcast %cst_155 : f32 to vector<1x4xf32>
    %391 = arith.select %389, %378, %390 : vector<1x4xi1>, vector<1x4xf32>
    %cst_156 = arith.constant dense<0.000000e+00> : vector<1xf32>
    %392 = vector.multi_reduction <add>, %391, %cst_156 [1] : vector<1x4xf32> to vector<1xf32>
    %393 = vector.shape_cast %392 : vector<1xf32> to vector<1x1xf32>
    %c-1_i32_157 = arith.constant -1 : i32
    %394 = arith.cmpi ne, %377, %c-1_i32_157 : i32
    %395 = arith.extui %394 : i1 to i32
    %396 = arith.sitofp %395 : i32 to f32
    %397 = arith.subf %387, %393 : vector<1x1xf32>
    %398 = vector.broadcast %396 : f32 to vector<1x1xf32>
    %399 = arith.mulf %397, %398 : vector<1x1xf32>
    %400 = arith.addf %374, %399 : vector<1x1xf32>
    %401 = vector.broadcast %396 : f32 to vector<1x1xf32>
    %402 = arith.addf %376, %401 : vector<1x1xf32>
    %403 = arith.divf %400, %402 : vector<1x1xf32>
    %c0_158 = arith.constant 0 : index
    %c0_159 = arith.constant 0 : index
    %404 = vector.load %arg22[%c0_158, %c0_159] : memref<1x1xf32, #tpu.memory_space<vmem>>, vector<1x1xf32>
    tpu.vector_store %arg22[%c0_158, %c0_159], %403 {strides = array<i32>} : memref<1x1xf32, #tpu.memory_space<vmem>>, vector<1x1xf32>,
    return
  }
}

</mosaic_0001>

<bundles_post_ra>
// kernel: bert_fc_forward.1
= control target key start
LH: loop header
LB: loop body
LE: loop exit
PB: predicated region body
PF: predicated region fallthrough
CT: control target
= control target key end

     0   :  { %s4025_s0 = inlined_call_operand.vmem [shape: f32[16,32], index: 0, kind: input, shape index: {}]   ;;  %s4026_s1 = inlined_call_operand.vmem [shape: f32[4,1,8], index: 1, kind: input, shape index: {}]   ;;  %s4027_s2 = inlined_call_operand.vmem [shape: s32[2], index: 2, kind: input, shape index: {}]   ;;  %s4028_s3 = inlined_call_operand.vmem [shape: f32[1,32], index: 3, kind: input, shape index: {}]   ;;  %s4029_s4 = inlined_call_operand.vmem [shape: f32[1,32], index: 4, kind: input, shape index: {}]   ;;  %s4030_s5 = inlined_call_operand.vmem [shape: f32[2,32,96], index: 5, kind: input, shape index: {}]   ;;  %s4031_s6 = inlined_call_operand.vmem [shape: f32[2,1,96], index: 6, kind: input, shape index: {}]   ;;  %s4032_s7 = inlined_call_operand.vmem [shape: f32[2,32,32], index: 7, kind: input, shape index: {}]   ;;  %s4033_s8 = inlined_call_operand.vmem [shape: f32[2,1,32], index: 8, kind: input, shape index: {}]   ;;  %s4034_s9 = inlined_call_operand.vmem [shape: f32[2,1,32], index: 9, kind: input, shape index: {}]   ;;  %s4035_s10 = inlined_call_operand.vmem [shape: f32[2,1,32], index: 10, kind: input, shape index: {}]   ;;  %s4036_s11 = inlined_call_operand.vmem [shape: f32[2,32,64], index: 11, kind: input, shape index: {}]   ;;  %s4037_s12 = inlined_call_operand.vmem [shape: f32[2,1,64], index: 12, kind: input, shape index: {}]   ;;  %s4038_s13 = inlined_call_operand.vmem [shape: f32[2,64,32], index: 13, kind: input, shape index: {}]   ;;  %s4039_s14 = inlined_call_operand.vmem [shape: f32[2,1,32], index: 14, kind: input, shape index: {}]   ;;  %s4040_s15 = inlined_call_operand.vmem [shape: f32[2,1,32], index: 15, kind: input, shape index: {}]   ;;  %s4041_s16 = inlined_call_operand.vmem [shape: f32[2,1,32], index: 16, kind: input, shape index: {}]   ;;  %s4042_s17 = inlined_call_operand.vmem [shape: f32[32,32], index: 17, kind: input, shape index: {}]   ;;  %s4043_s18 = inlined_call_operand.vmem [shape: f32[1,32], index: 18, kind: input, shape index: {}]   ;;  %s4044_s19 = inlined_call_operand.vmem [shape: f32[32,4], index: 19, kind: input, shape index: {}]   ;;  %s4045_s20 = inlined_call_operand.vmem [shape: f32[1,4], index: 20, kind: input, shape index: {}]   ;;  %s4046_s21 = inlined_call_operand.vmem [shape: s32[2,1], index: 21, kind: output, shape index: {0}]   ;;  %s4047_s22 = inlined_call_operand.hbm [shape: f32[1,1], index: 22, kind: output, shape index: {1}]  }
   0x1   :  { %4052 = sst [smem:[#allocation8_spill]] %s4025_s0 }
   0x2   :  { %4053 = sst [smem:[#allocation9_spill]] %s4026_s1 }
   0x3   :  { %4054 = sst [smem:[#allocation10_spill]] %s4027_s2 }
   0x4   :  { %4055 = sst [smem:[#allocation11_spill]] %s4028_s3 }
   0x5   :  { %4056 = sst [smem:[#allocation12_spill]] %s4029_s4 }
   0x6   :  { %4057 = sst [smem:[#allocation13_spill]] %s4030_s5 }
   0x7   :  { %4058 = sst [smem:[#allocation14_spill]] %s4031_s6 }
   0x8   :  { %28 = vsyncpa [#allocation4], 0 }
   0x9   :  { %29 = vsyncpa [#allocation3], 0  ;;  %s4059_s29 = sld [smem:[#allocation10_spill]] }
   0xf   :  { %s40_s30 = sshll.u32 %s4059_s29, 4  ;;  %s41_s30 = int_to_ptr.vmem [resolvable:$true] %s40_s30 }
  0x10   :  { %s3393_s4 = scalar_lea.vmem %s41_s30, 16  ;;  %p3398_p1 = scmp.lt.s32.totalorder %s41_s30, %s41_s30 }
  0x11   :  { %p3394_p0 = scmp.ne.s32.totalorder %s41_s30, %s3393_s4  ;;  %p3399_p2 = scmp.lt.s32.totalorder %s3393_s4, %s3393_s4 }
  0x13   :  { %p3400_p3 = por %p3399_p2, %p3398_p1 }
  0x15   :  { %p3401_p4 = pnand %p3400_p3, %p3394_p0 }
  0x17   :  { %3404 = shalt.err (!%p3401_p4)
}
  0x18   :  { %s3429_s0 = smov [#allocation2]  }
  0x19   :  { %43 = dma.vmem_to_smem %s41_s30, 16, %s3429_s0, [#allocation4]  }
  0x1a   :  { %3425 = dma.done.wait [#allocation4], 16  }
  0x1b   :  { %3426 = vsyncadd [#allocation4], 4294967280 }
  0x1c   :  { %83 = sfence }
  0x1d   :  { %s4060_s5 = sld [smem:[#allocation8_spill]]  ;;  %vm88_vm0 = vcmask 261120   ;;  %v3430_v34 = vmov 0.0   ;;  %vm3431_vm1 = vmmov 0   ;;  %s3432_s3 = smov 112   ;;  %vm260_vm2 = vcmask 130048  }
  0x1e   :  { %s4061_s2 = sld [smem:[#allocation13_spill]]  ;;  %3113 = vmatprep.subr.mxu1 %v3430_v34  ;;  %3115 = vmatprep.mubr.msk.f32.mxu1 %vm3431_vm1, %v3430_v34  ;;  %s3433_s28 = smov 96   ;;  %vm563_vm3 = vcmask 64512   ;;  %vm1258_vm4 = vcmask 523264   ;;  %vm2635_vm5 = vcmask 1041409   ;;  %vm2848_vm6 = vcmask 25601  }
  0x1f   :  { %s4062_s1 = sld [smem:[#allocation11_spill]]  ;;  %s3434_s25 = smov 64   ;;  %vm2796_vm7 = vcmask 25600   ;;  %vm2820_vm8 = vcmask 24576   ;;  %vm2880_vm13 = vcmask 0  }
  0x20   :  { %s4063_s6 = sld [smem:[#allocation12_spill]] }
  0x21   :  { %s4064_s27 = sld [smem:[#allocation14_spill]] }
  0x22   :  { %s4065_s4 = sld [smem:[#allocation9_spill]] }
  0x23   :  { %v84_v0 = vld [vmem:[%s4060_s5] sm:$0xff]  ;;  %v85_v1 = vld [vmem:[%s4060_s5 + $0x8] sm:$0xff] }
  0x24   :  { %v89_v2 = vsel %vm88_vm0, %v84_v0, 0.0  ;;  %v92_v3 = vsel %vm88_vm0, %v85_v1, 0.0  ;;  %v139_v14 = vld [vmem:[%s4061_s2 + $0x18] sm:$0xff]  ;;  %v138_v15 = vld [vmem:[%s4061_s2 + $0x10] sm:$0xff]  ;;  %v137_v16 = vld [vmem:[%s4061_s2 + $0x8] sm:$0xff] }
  0x25   :  { %90 = vadd.xlane.f32.xlu0 %v89_v2  ;;  %3102 = vmatprep.subr.mxu0 %v139_v14  ;;  %v136_v17 = vld [vmem:[%s4061_s2] sm:$0xff] }
  0x26   :  { %3103 = vmatpush3.msra.mxu0 %v139_v14  ;;  %v2901_v25 = vld [vmem:[%s4062_s1] ss:$0 sm:$0xff] }
  0x27   :  { %3104 = vmatprep.subr.mxu0 %v138_v15  ;;  %v2902_v27 = vld [vmem:[%s4063_s6] ss:$0 sm:$0xff] }
  0x28   :  { %3105 = vmatpush3.msra.mxu0 %v138_v15  ;;  %v2903_v35 = vld [vmem:[%s4064_s27] ss:$0 sm:$0xff]  ;;  %v3653_v51 = vld [vmem:[%s4065_s4 + $0x1] ss:$0 sm:$0xff]  ;;  %v3659_v55 = vld [vmem:[%s4065_s4 + $0x2] ss:$0 sm:$0xff] }
  0x29   :  { %93 = vadd.xlane.f32.xlu0 %v92_v3  ;;  %3106 = vmatprep.subr.mxu0 %v137_v16  ;;  %v3646_v46 = vld [vmem:[%s4065_s4] ss:$0 sm:$0xff]  ;;  %v3666_v60 = vld [vmem:[%s4065_s4 + $0x3] ss:$0 sm:$0xff] }
  0x2a   :  { %3107 = vmatpush3.msra.mxu0 %v137_v16 }
  0x2b   :  { %3108 = vmatprep.subr.mxu0 %v136_v17 }
  0x2c   :  { %3109 = vmatpush3.msra.mxu0 %v136_v17 }
  0x2d   :  { %3133 = vmatprep.subr.mxu0 %v3430_v34 }
  0xae   :  { %v91_v4 = vpop.xlane.xlu0 %90 }
  0xaf   :  { %v96_v5 = vmul.f32 0.03125, %v91_v4 }
  0xb1   :  { %v98_v6 = vsub.f32 %v84_v0, %v96_v5 }
  0xb2   :  { %v94_v7 = vpop.xlane.xlu0 %93 }
  0xb3   :  { %v97_v8 = vmul.f32 0.03125, %v94_v7  ;;  %v100_v9 = vmul.f32 %v98_v6, %v98_v6 }
  0xb5   :  { %v99_v10 = vsub.f32 %v85_v1, %v97_v8  ;;  %v102_v11 = vsel %vm88_vm0, %v100_v9, 0.0 }
  0xb6   :  { %103 = vadd.xlane.f32.xlu1 %v102_v11 }
  0xb7   :  { %v101_v12 = vmul.f32 %v99_v10, %v99_v10 }
  0xb9   :  { %v105_v13 = vsel %vm88_vm0, %v101_v12, 0.0 }
  0xba   :  { %106 = vadd.xlane.f32.xlu1 %v105_v13 }
 0x13f   :  { %v104_v18 = vpop.xlane.xlu1 %103 }
 0x140   :  { %v108_v19 = vmul.f32 0.03125, %v104_v18 }
 0x142   :  { %v110_v20 = vadd.f32 1e-12, %v108_v19 }
 0x143   :  { %v107_v21 = vpop.xlane.xlu1 %106 }
 0x144   :  { %3321 = vrsqrt.f32 %v110_v20  ;;  %v109_v22 = vmul.f32 0.03125, %v107_v21 }
 0x146   :  { %v111_v23 = vadd.f32 1e-12, %v109_v22 }
 0x148   :  { %3323 = vrsqrt.f32 %v111_v23 }
 0x151   :  { %v3322_v24 = vpop.eup %3321 }
 0x152   :  { %v114_v26 = vmul.f32 %v3322_v24, %v98_v6 }
 0x154   :  { %v122_v28 = vmul.f32 %v2901_v25, %v114_v26 }
 0x155   :  { %v3324_v29 = vpop.eup %3323 }
 0x156   :  { %v115_v30 = vmul.f32 %v3324_v29, %v99_v10  ;;  %v3582_v31 = vadd.f32 %v2902_v27, %v122_v28 }
 0x158   :  { %v123_v32 = vmul.f32 %v2901_v25, %v115_v30  ;;  %3110 = vmatprep.mubr.msk.f32.mxu0 %vm88_vm0, %v3582_v31 }
 0x15a   :  { %v3586_v33 = vadd.f32 %v2902_v27, %v123_v32 }
 0x15c   :  { %3111 = vmatmul.mubr.msk.f32.vlgmr.msra.gmra.mxu0 %vm88_vm0, %v3586_v33 }
 0x15d   :  { %3135 = vmatprep.mubr.msk.f32.mxu0 %vm3431_vm1, %v3430_v34 }
 0x21c   :  { %v3112_v36 = vpop.f32.mrf.mxu0 }
 0x21d   :  { %v3599_v37 = vadd.f32 %v3112_v36, %v2903_v35 }
 0x21e   :  { %v219_v38 = vpop.f32.mrf.mxu0 }
 0x21f   :  { %v3601_v39 = vadd.f32 %v2903_v35, %v219_v38  ;;  %232 = vrot.lane.b32.xlu1 %v3599_v37, %s3432_s3 }
 0x221   :  { %229 = vrot.lane.b32.xlu0 %v3601_v39, %s3432_s3 }
 0x223   :  { %258 = vrot.lane.b32.xlu1 %v3601_v39, %s3433_s28 }
 0x225   :  { %411 = vrot.lane.b32.xlu0 %v3599_v37, %s3433_s28 }
 0x291   :  { %v3611_v40 = vpop.permute.xlu1 %232 }
 0x293   :  { %v3613_v41 = vpop.permute.xlu0 %229 }
 0x294   :  { %335 = vrot.lane.b32.xlu1 %v3613_v41, %s3433_s28 }
 0x295   :  { %v259_v42 = vpop.permute.xlu1 %258 }
 0x296   :  { %3114 = vmatpush3.xpose.msk.msra.mxu1 %vm260_vm2, %v259_v42  ;;  %v912_v42 = vld [vmem:[%s4032_s7] sm:$0xff] }
 0x297   :  { %3118 = vmatprep.subr.mxu1 %v3430_v34  ;;  %v412_v44 = vpop.permute.xlu0 %411 }
 0x298   :  { %487 = vrot.lane.b32.xlu1 %v3611_v40, %s3433_s28 }
 0x299   :  { %3116 = vmatmul.mubr.msk.f32.vlgmr.msra.gmra.mxu1 %vm260_vm2, %v3601_v39 }
 0x29a   :  { %3120 = vmatprep.mubr.msk.f32.mxu1 %vm3431_vm1, %v3430_v34 }
 0x306   :  { %v336_v43 = vpop.permute.xlu1 %335 }
 0x307   :  { %3119 = vmatpush3.xpose.msk.msra.mxu1 %vm260_vm2, %v336_v43  ;;  %v915_v43 = vld [vmem:[%s4032_s7 + $0x18] sm:$0xff] }
 0x308   :  { %3123 = vmatprep.subr.mxu1 %v3430_v34 }
 0x30a   :  { %3121 = vmatmul.mubr.msk.f32.vlgmr.msra.gmra.mxu1 %vm260_vm2, %v3613_v41  ;;  %v488_v45 = vpop.permute.xlu1 %487 }
 0x30b   :  { %3124 = vmatpush3.xpose.msk.msra.mxu1 %vm260_vm2, %v412_v44  ;;  %3125 = vmatprep.mubr.msk.f32.mxu1 %vm3431_vm1, %v3430_v34  ;;  %v914_v44 = vld [vmem:[%s4032_s7 + $0x10] sm:$0xff] }
 0x30c   :  { %3128 = vmatprep.subr.mxu1 %v3430_v34 }
 0x30e   :  { %3126 = vmatmul.mubr.msk.f32.vlgmr.msra.gmra.mxu1 %vm260_vm2, %v3599_v37 }
 0x30f   :  { %3129 = vmatpush3.xpose.msk.msra.mxu1 %vm260_vm2, %v488_v45  ;;  %3130 = vmatprep.mubr.msk.f32.mxu1 %vm3431_vm1, %v3430_v34 }
 0x310   :  { %3138 = vmatprep.subr.mxu1 %v3430_v34 }
 0x312   :  { %3131 = vmatmul.mubr.msk.f32.vlgmr.msra.gmra.mxu1 %vm260_vm2, %v3611_v40 }
 0x313   :  { %3140 = vmatprep.mubr.msk.f32.mxu1 %vm3431_vm1, %v3430_v34 }
 0x359   :  { %v331_v47 = vpop.f32.mrf.mxu1 }
 0x35a   :  { %v332_v48 = vadd.f32 %v3646_v46, %v331_v47 }
 0x35b   :  { %v3117_v49 = vpop.f32.mrf.mxu1 }
 0x35c   :  { %v564_v50 = vsel %vm563_vm3, %v332_v48, -inf }
 0x35d   :  { %565 = vmax.xlane.f32.xlu0 %v564_v50 }
 0x3ca   :  { %v407_v52 = vpop.f32.mrf.mxu1 }
 0x3cb   :  { %v408_v53 = vadd.f32 %v3653_v51, %v407_v52 }
 0x3cc   :  { %v3122_v54 = vpop.f32.mrf.mxu1 }
 0x3cd   :  { %v567_v56 = vsel %vm563_vm3, %v408_v53, -inf }
 0x3ce   :  { %568 = vmax.xlane.f32.xlu1 %v567_v56  ;;  %v483_v57 = vpop.f32.mrf.mxu1 }
 0x3cf   :  { %v484_v58 = vadd.f32 %v3659_v55, %v483_v57 }
 0x3d0   :  { %v3127_v59 = vpop.f32.mrf.mxu1 }
 0x3d1   :  { %v570_v61 = vsel %vm563_vm3, %v484_v58, -inf }
 0x3d2   :  { %571 = vmax.xlane.f32.xlu0 %v570_v61  ;;  %v559_v62 = vpop.f32.mrf.mxu1 }
 0x3d3   :  { %v560_v63 = vadd.f32 %v3666_v60, %v559_v62 }
 0x3d4   :  { %v3132_v0 = vpop.f32.mrf.mxu1 }
 0x3d5   :  { %v573_v1 = vsel %vm563_vm3, %v560_v63, -inf }
 0x3d6   :  { %574 = vmax.xlane.f32.xlu0 %v573_v1 }
 0x3e6   :  { %v566_v2 = vpop.xlane.xlu0 %565 }
 0x3e7   :  { %v576_v3 = vsub.f32 %v332_v48, %v566_v2 }
 0x3e9   :  { %v580_v4 = vmul.f32 1.442695, %v576_v3 }
 0x3eb   :  { %3325 = vpow2.f32 %v580_v4 }
 0x3f8   :  { %v3326_v5 = vpop.eup %3325 }
 0x3f9   :  { %v588_v6 = vsel %vm563_vm3, %v3326_v5, 0.0 }
 0x3fa   :  { %589 = vadd.xlane.f32.xlu0 %v588_v6 }
 0x457   :  { %v569_v7 = vpop.xlane.xlu1 %568 }
 0x458   :  { %v577_v8 = vsub.f32 %v408_v53, %v569_v7 }
 0x45a   :  { %v582_v9 = vmul.f32 1.442695, %v577_v8 }
 0x45b   :  { %v572_v10 = vpop.xlane.xlu0 %571 }
 0x45c   :  { %3327 = vpow2.f32 %v582_v9  ;;  %v578_v11 = vsub.f32 %v484_v58, %v572_v10  ;;  %v2926_v58 = vld [vmem:[%s4033_s8] ss:$0 sm:$0xff] }
 0x45e   :  { %v584_v12 = vmul.f32 1.442695, %v578_v11 }
 0x45f   :  { %v575_v17 = vpop.xlane.xlu0 %574 }
 0x460   :  { %3329 = vpow2.f32 %v584_v12  ;;  %v579_v18 = vsub.f32 %v560_v63, %v575_v17  ;;  %v1133_v17 = vld [vmem:[%s4036_s11] sm:$0xff] }
 0x462   :  { %v586_v19 = vmul.f32 1.442695, %v579_v18 }
 0x464   :  { %3331 = vpow2.f32 %v586_v19 }
 0x469   :  { %v3328_v13 = vpop.eup %3327 }
 0x46a   :  { %v591_v14 = vsel %vm563_vm3, %v3328_v13, 0.0 }
 0x46b   :  { %592 = vadd.xlane.f32.xlu1 %v591_v14 }
 0x46d   :  { %v3330_v15 = vpop.eup %3329 }
 0x46e   :  { %v594_v16 = vsel %vm563_vm3, %v3330_v15, 0.0 }
 0x46f   :  { %595 = vadd.xlane.f32.xlu0 %v594_v16  ;;  %v1134_v16 = vld [vmem:[%s4036_s11 + $0x8] sm:$0xff] }
 0x471   :  { %v3332_v20 = vpop.eup %3331 }
 0x472   :  { %v597_v21 = vsel %vm563_vm3, %v3332_v20, 0.0 }
 0x47c   :  { %684 = vrot.lane.b32.xlu1 %v3613_v41, %s3434_s25  ;;  %v913_v41 = vld [vmem:[%s4032_s7 + $0x8] sm:$0xff] }
 0x480   :  { %760 = vrot.lane.b32.xlu1 %v3599_v37, %s3434_s25 }
 0x483   :  { %v590_v22 = vpop.xlane.xlu0 %589 }
 0x484   :  { %3333 = vrcp.f32 %v590_v22 }
 0x485   :  { %608 = vrot.lane.b32.xlu0 %v3601_v39, %s3434_s25 }
 0x491   :  { %v3334_v26 = vpop.eup %3333 }
 0x492   :  { %v604_v28 = vmul.f32 %v3334_v26, %v3326_v5 }
 0x4a4   :  { %598 = vadd.xlane.f32.xlu1 %v597_v21 }
 0x4b5   :  { %836 = vrot.lane.b32.xlu1 %v3611_v40, %s3434_s25 }
 0x4f4   :  { %v593_v23 = vpop.xlane.xlu1 %592 }
 0x4f5   :  { %3335 = vrcp.f32 %v593_v23 }
 0x4f8   :  { %v596_v24 = vpop.xlane.xlu0 %595  ;;  %v685_v25 = vpop.permute.xlu1 %684 }
 0x4f9   :  { %3337 = vrcp.f32 %v596_v24  ;;  %3139 = vmatpush3.msra.mxu1 %v685_v25  ;;  %v2927_v25 = vld [vmem:[%s4034_s9] ss:$0 sm:$0xff] }
 0x4fa   :  { %3148 = vmatprep.subr.mxu1 %v3430_v34 }
 0x4fc   :  { %v609_v27 = vpop.permute.xlu0 %608  ;;  %v761_v29 = vpop.permute.xlu1 %760 }
 0x4fd   :  { %3134 = vmatpush3.msra.mxu0 %v609_v27  ;;  %v2928_v27 = vld [vmem:[%s4035_s10] ss:$0 sm:$0xff] }
 0x4fe   :  { %3136 = vmatmul.mubr.msk.f32.vlgmr.msra.gmra.mxu0 %vm563_vm3, %v604_v28  ;;  %3143 = vmatprep.subr.mxu0 %v3430_v34 }
 0x4ff   :  { %3144 = vmatpush3.msra.mxu0 %v761_v29  ;;  %3145 = vmatprep.mubr.msk.f32.mxu0 %vm3431_vm1, %v3430_v34 }
 0x500   :  { %3153 = vmatprep.subr.mxu0 %v915_v43 }
 0x502   :  { %v3336_v30 = vpop.eup %3335 }
 0x503   :  { %v605_v32 = vmul.f32 %v3336_v30, %v3328_v13 }
 0x505   :  { %3141 = vmatmul.mubr.msk.f32.vlgmr.msra.gmra.mxu1 %vm563_vm3, %v605_v32 }
 0x506   :  { %v3338_v35 = vpop.eup %3337  ;;  %3150 = vmatprep.mubr.msk.f32.mxu1 %vm3431_vm1, %v3430_v34 }
 0x507   :  { %v606_v36 = vmul.f32 %v3338_v35, %v3330_v15  ;;  %v1135_v15 = vld [vmem:[%s4036_s11 + $0x10] sm:$0xff] }
 0x509   :  { %3146 = vmatmul.mubr.msk.f32.vlgmr.msra.gmra.mxu0 %vm563_vm3, %v606_v36 }
 0x50a   :  { %3154 = vmatpush3.msra.mxu0 %v915_v43  ;;  %v1244_v43 = vld [vmem:[%s4038_s13 + $0x8] sm:$0xff] }
 0x50b   :  { %3155 = vmatprep.subr.mxu0 %v914_v44 }
 0x50c   :  { %3156 = vmatpush3.msra.mxu0 %v914_v44  ;;  %v1243_v44 = vld [vmem:[%s4038_s13] sm:$0xff] }
 0x52d   :  { %v599_v37 = vpop.xlane.xlu1 %598 }
 0x52e   :  { %3339 = vrcp.f32 %v599_v37  ;;  %v1250_v37 = vld [vmem:[%s4038_s13 + $0x38] sm:$0xff] }
 0x531   :  { %v837_v38 = vpop.permute.xlu1 %836 }
 0x532   :  { %3149 = vmatpush3.msra.mxu1 %v837_v38  ;;  %v1249_v38 = vld [vmem:[%s4038_s13 + $0x30] sm:$0xff] }
 0x533   :  { %3160 = vmatprep.subr.mxu1 %v913_v41 }
 0x53b   :  { %v3340_v39 = vpop.eup %3339 }
 0x53c   :  { %v607_v40 = vmul.f32 %v3340_v39, %v3332_v20  ;;  %v1248_v39 = vld [vmem:[%s4038_s13 + $0x28] sm:$0xff] }
 0x53e   :  { %3151 = vmatmul.mubr.msk.f32.vlgmr.msra.gmra.mxu1 %vm563_vm3, %v607_v40  ;;  %v1247_v40 = vld [vmem:[%s4038_s13 + $0x20] sm:$0xff] }
 0x53f   :  { %3161 = vmatpush3.msra.mxu1 %v913_v41  ;;  %v1246_v41 = vld [vmem:[%s4038_s13 + $0x18] sm:$0xff] }
 0x540   :  { %3162 = vmatprep.subr.mxu1 %v912_v42 }
 0x541   :  { %3163 = vmatpush3.msra.mxu1 %v912_v42  ;;  %v1245_v42 = vld [vmem:[%s4038_s13 + $0x10] sm:$0xff] }
 0x542   :  { %3178 = vmatprep.subr.mxu1 %v1250_v37 }
 0x5be   :  { %v680_v45 = vpop.f32.mrf.mxu0 }
 0x5bf   :  { %3164 = vmatprep.mubr.msk.f32.mxu1 %vm260_vm2, %v680_v45  ;;  %v2929_v45 = vld [vmem:[%s4037_s12] ss:$0 sm:$0xff] }
 0x5c0   :  { %v3137_v47 = vpop.f32.mrf.mxu0 }
 0x5c5   :  { %v756_v48 = vpop.f32.mrf.mxu1 }
 0x5c6   :  { %3157 = vmatprep.mubr.msk.f32.mxu0 %vm260_vm2, %v756_v48 }
 0x5c7   :  { %v3142_v49 = vpop.f32.mrf.mxu1 }
 0x5c9   :  { %v832_v50 = vpop.f32.mrf.mxu0 }
 0x5ca   :  { %3165 = vmatmul.mubr.msk.f32.vlgmr.msra.gmra.mxu1 %vm260_vm2, %v832_v50 }
 0x5cb   :  { %v3147_v52 = vpop.f32.mrf.mxu0  ;;  %3179 = vmatpush3.msra.mxu1 %v1250_v37 }
 0x5cc   :  { %3180 = vmatprep.subr.mxu1 %v1249_v38 }
 0x5cd   :  { %3181 = vmatpush3.msra.mxu1 %v1249_v38 }
 0x5ce   :  { %3182 = vmatprep.subr.mxu1 %v1248_v39 }
 0x5cf   :  { %3183 = vmatpush3.msra.mxu1 %v1248_v39  ;;  %v2935_v39 = vld [vmem:[%s4040_s15] ss:$0 sm:$0xff] }
 0x5d0   :  { %3184 = vmatprep.subr.mxu1 %v1247_v40 }
 0x5d1   :  { %3185 = vmatpush3.msra.mxu1 %v1247_v40 }
 0x5d2   :  { %3186 = vmatprep.subr.mxu1 %v1246_v41 }
 0x5d3   :  { %3187 = vmatpush3.msra.mxu1 %v1246_v41 }
 0x5d4   :  { %3188 = vmatprep.subr.mxu1 %v1245_v42 }
 0x5d5   :  { %3189 = vmatpush3.msra.mxu1 %v1245_v42 }
 0x5d6   :  { %3190 = vmatprep.subr.mxu1 %v1244_v43 }
 0x5d7   :  { %3191 = vmatpush3.msra.mxu1 %v1244_v43 }
 0x5d8   :  { %3192 = vmatprep.subr.mxu1 %v1243_v44 }
 0x5d9   :  { %3193 = vmatpush3.msra.mxu1 %v1243_v44  ;;  %v2936_v44 = vld [vmem:[%s4041_s16] ss:$0 sm:$0xff] }
 0x5da   :  { %3213 = vmatprep.subr.mxu1 %v3430_v34 }
 0x5fe   :  { %v908_v53 = vpop.f32.mrf.mxu1 }
 0x5ff   :  { %3158 = vmatmul.mubr.msk.f32.vlgmr.msra.gmra.mxu0 %vm260_vm2, %v908_v53 }
 0x600   :  { %v3152_v54 = vpop.f32.mrf.mxu1 }
 0x68a   :  { %v3166_v56 = vpop.f32.mrf.mxu1 }
 0x68c   :  { %v1069_v61 = vpop.f32.mrf.mxu1 }
 0x6bf   :  { %v3159_v57 = vpop.f32.mrf.mxu0 }
 0x6c0   :  { %v1075_v59 = vadd.f32 %v3166_v56, %v3159_v57 }
 0x6c1   :  { %v988_v62 = vpop.f32.mrf.mxu0 }
 0x6c2   :  { %v1086_v63 = vadd.f32 %v2926_v58, %v1075_v59  ;;  %v1070_v0 = vadd.f32 %v1069_v61, %v988_v62 }
 0x6c4   :  { %v1085_v1 = vadd.f32 %v2926_v58, %v1070_v0  ;;  %v1088_v2 = vadd.f32 %v1086_v63, %v3586_v33 }
 0x6c6   :  { %v1094_v3 = vsel %vm88_vm0, %v1088_v2, 0.0  ;;  %v1087_v4 = vadd.f32 %v1085_v1, %v3582_v31  ;;  %v1136_v31 = vld [vmem:[%s4036_s11 + $0x18] sm:$0xff] }
 0x6c7   :  { %1095 = vadd.xlane.f32.xlu1 %v1094_v3  ;;  %3167 = vmatprep.subr.mxu0 %v1136_v31 }
 0x6c8   :  { %v1091_v5 = vsel %vm88_vm0, %v1087_v4, 0.0  ;;  %3168 = vmatpush3.msra.mxu0 %v1136_v31 }
 0x6c9   :  { %1092 = vadd.xlane.f32.xlu0 %v1091_v5  ;;  %3169 = vmatprep.subr.mxu0 %v1135_v15 }
 0x6ca   :  { %3170 = vmatpush3.msra.mxu0 %v1135_v15 }
 0x6cb   :  { %3171 = vmatprep.subr.mxu0 %v1134_v16 }
 0x6cc   :  { %3172 = vmatpush3.msra.mxu0 %v1134_v16 }
 0x6cd   :  { %3173 = vmatprep.subr.mxu0 %v1133_v17 }
 0x6ce   :  { %3174 = vmatpush3.msra.mxu0 %v1133_v17 }
 0x750   :  { %v1096_v6 = vpop.xlane.xlu1 %1095 }
 0x751   :  { %v1098_v7 = vmul.f32 0.03125, %v1096_v6 }
 0x752   :  { %v1093_v8 = vpop.xlane.xlu0 %1092 }
 0x753   :  { %v1097_v9 = vmul.f32 0.03125, %v1093_v8  ;;  %v1100_v10 = vsub.f32 %v1088_v2, %v1098_v7  ;;  %v2932_v8 = vld [vmem:[%s4039_s14] ss:$0 sm:$0xff] }
 0x755   :  { %v1099_v11 = vsub.f32 %v1087_v4, %v1097_v9  ;;  %v1102_v14 = vmul.f32 %v1100_v10, %v1100_v10 }
 0x757   :  { %v1101_v12 = vmul.f32 %v1099_v11, %v1099_v11  ;;  %v1106_v33 = vsel %vm88_vm0, %v1102_v14, 0.0 }
 0x759   :  { %v1103_v13 = vsel %vm88_vm0, %v1101_v12, 0.0 }
 0x75a   :  { %1104 = vadd.xlane.f32.xlu0 %v1103_v13 }
 0x75e   :  { %1107 = vadd.xlane.f32.xlu0 %v1106_v33 }
 0x7e3   :  { %v1105_v18 = vpop.xlane.xlu0 %1104 }
 0x7e4   :  { %v1109_v19 = vmul.f32 0.03125, %v1105_v18 }
 0x7e6   :  { %v1111_v20 = vadd.f32 1e-12, %v1109_v19 }
 0x7e7   :  { %v1108_v21 = vpop.xlane.xlu0 %1107 }
 0x7e8   :  { %3341 = vrsqrt.f32 %v1111_v20  ;;  %v1110_v22 = vmul.f32 0.03125, %v1108_v21 }
 0x7ea   :  { %v1112_v23 = vadd.f32 1e-12, %v1110_v22 }
 0x7ec   :  { %3343 = vrsqrt.f32 %v1112_v23 }
 0x7f5   :  { %v3342_v24 = vpop.eup %3341 }
 0x7f6   :  { %v1115_v26 = vmul.f32 %v3342_v24, %v1099_v11 }
 0x7f8   :  { %v1123_v28 = vmul.f32 %v2927_v25, %v1115_v26  ;;  %v2939_v26 = vld [vmem:[%s4061_s2 + $0x30] sm:$0xff] }
 0x7f9   :  { %v3344_v29 = vpop.eup %3343 }
 0x7fa   :  { %v1116_v30 = vmul.f32 %v3344_v29, %v1100_v10  ;;  %v3736_v32 = vadd.f32 %v2928_v27, %v1123_v28  ;;  %v2937_v28 = vld [vmem:[%s4061_s2 + $0x20] sm:$0xff] }
 0x7fc   :  { %v1124_v35 = vmul.f32 %v2927_v25, %v1116_v30  ;;  %3175 = vmatprep.mubr.msk.f32.mxu0 %vm88_vm0, %v3736_v32  ;;  %v2940_v25 = vld [vmem:[%s4061_s2 + $0x38] sm:$0xff] }
 0x7fd   :  { %3197 = vmatprep.subr.mxu0 %v2940_v25 }
 0x7fe   :  { %v1132_v36 = vadd.f32 %v2928_v27, %v1124_v35  ;;  %v2938_v27 = vld [vmem:[%s4061_s2 + $0x28] sm:$0xff] }
 0x800   :  { %3176 = vmatmul.mubr.msk.f32.vlgmr.msra.gmra.mxu0 %vm88_vm0, %v1132_v36 }
 0x801   :  { %3198 = vmatpush3.msra.mxu0 %v2940_v25 }
 0x802   :  { %3199 = vmatprep.subr.mxu0 %v2939_v26 }
 0x803   :  { %3200 = vmatpush3.msra.mxu0 %v2939_v26 }
 0x804   :  { %3201 = vmatprep.subr.mxu0 %v2938_v27 }
 0x805   :  { %3202 = vmatpush3.msra.mxu0 %v2938_v27 }
 0x806   :  { %3203 = vmatprep.subr.mxu0 %v2937_v28 }
 0x807   :  { %3204 = vmatpush3.msra.mxu0 %v2937_v28 }
 0x808   :  { %3208 = vmatprep.subr.mxu0 %v3430_v34 }
 0x8c0   :  { %v3177_v47 = vpop.f32.mrf.mxu0 }
 0x8c1   :  { %v1222_v48 = vadd.f32 %v3177_v47, %v2929_v45 }
 0x8c2   :  { %v1216_v49 = vpop.f32.mrf.mxu0 }
 0x8c3   :  { %v1226_v50 = vmul.f32 %v1222_v48, %v1222_v48  ;;  %v1217_v52 = vadd.f32 %v2929_v45, %v1216_v49  ;;  %v2942_v49 = vld [vmem:[%s4064_s27 + $0x1] ss:$0 sm:$0xff] }
 0x8c5   :  { %v1228_v53 = vmul.f32 %v1226_v50, %v1222_v48  ;;  %v1225_v54 = vmul.f32 %v1217_v52, %v1217_v52 }
 0x8c7   :  { %v1230_v56 = vmul.f32 0.044715, %v1228_v53  ;;  %v1227_v57 = vmul.f32 %v1225_v54, %v1217_v52 }
 0x8c9   :  { %v1232_v58 = vadd.f32 %v1230_v56, %v1222_v48  ;;  %v1229_v59 = vmul.f32 0.044715, %v1227_v57 }
 0x8cb   :  { %v1234_v61 = vmul.f32 0.7978846, %v1232_v58  ;;  %v1231_v62 = vadd.f32 %v1229_v59, %v1217_v52 }
 0x8cd   :  { %3345 = vtanh.f32 %v1234_v61  ;;  %v1233_v63 = vmul.f32 0.7978846, %v1231_v62 }
 0x8cf   :  { %3347 = vtanh.f32 %v1233_v63 }
 0x8da   :  { %v3346_v0 = vpop.eup %3345 }
 0x8db   :  { %v1238_v1 = vadd.f32 1.0, %v3346_v0 }
 0x8dc   :  { %v3348_v2 = vpop.eup %3347 }
 0x8dd   :  { %v1237_v3 = vadd.f32 1.0, %v3348_v2  ;;  %v1240_v4 = vmul.f32 0.5, %v1238_v1 }
 0x8df   :  { %v1239_v5 = vmul.f32 0.5, %v1237_v3  ;;  %v1242_v7 = vmul.f32 %v1240_v4, %v1222_v48 }
 0x8e1   :  { %v1241_v6 = vmul.f32 %v1239_v5, %v1217_v52 }
 0x8e3   :  { %3194 = vmatprep.mubr.msk.f32.mxu1 %vm1258_vm4, %v1241_v6 }
 0x8e4   :  { %3195 = vmatmul.mubr.msk.f32.vlgmr.msra.gmra.mxu1 %vm1258_vm4, %v1242_v7 }
 0x8e5   :  { %3215 = vmatprep.mubr.msk.f32.mxu1 %vm3431_vm1, %v3430_v34 }
 0x9a4   :  { %v3196_v9 = vpop.f32.mrf.mxu1 }
 0x9a5   :  { %v1337_v10 = vadd.f32 %v3196_v9, %v2932_v8 }
 0x9a6   :  { %v1331_v11 = vpop.f32.mrf.mxu1 }
 0x9a7   :  { %v1332_v12 = vadd.f32 %v2932_v8, %v1331_v11  ;;  %v1341_v13 = vadd.f32 %v1337_v10, %v1132_v36 }
 0x9a9   :  { %v1347_v14 = vsel %vm88_vm0, %v1341_v13, 0.0  ;;  %v1340_v33 = vadd.f32 %v1332_v12, %v3736_v32 }
 0x9aa   :  { %1348 = vadd.xlane.f32.xlu1 %v1347_v14 }
 0x9ab   :  { %v1344_v31 = vsel %vm88_vm0, %v1340_v33, 0.0 }
 0x9ac   :  { %1345 = vadd.xlane.f32.xlu0 %v1344_v31 }
 0xa33   :  { %v1349_v15 = vpop.xlane.xlu1 %1348 }
 0xa34   :  { %v1351_v16 = vmul.f32 0.03125, %v1349_v15 }
 0xa35   :  { %v1346_v17 = vpop.xlane.xlu0 %1345 }
 0xa36   :  { %v1353_v18 = vsub.f32 %v1341_v13, %v1351_v16  ;;  %v1350_v19 = vmul.f32 0.03125, %v1346_v17 }
 0xa38   :  { %v1352_v20 = vsub.f32 %v1340_v33, %v1350_v19  ;;  %v1355_v21 = vmul.f32 %v1353_v18, %v1353_v18 }
 0xa3a   :  { %v1359_v22 = vsel %vm88_vm0, %v1355_v21, 0.0  ;;  %v1354_v23 = vmul.f32 %v1352_v20, %v1352_v20 }
 0xa3b   :  { %1360 = vadd.xlane.f32.xlu1 %v1359_v22 }
 0xa3c   :  { %v1356_v24 = vsel %vm88_vm0, %v1354_v23, 0.0 }
 0xa3d   :  { %1357 = vadd.xlane.f32.xlu0 %v1356_v24 }
 0xac4   :  { %v1361_v29 = vpop.xlane.xlu1 %1360 }
 0xac5   :  { %v1363_v30 = vmul.f32 0.03125, %v1361_v29 }
 0xac6   :  { %v1358_v32 = vpop.xlane.xlu0 %1357 }
 0xac7   :  { %v1365_v35 = vadd.f32 1e-12, %v1363_v30  ;;  %v1362_v36 = vmul.f32 0.03125, %v1358_v32 }
 0xac9   :  { %3349 = vrsqrt.f32 %v1365_v35  ;;  %v1364_v37 = vadd.f32 1e-12, %v1362_v36 }
 0xacb   :  { %3351 = vrsqrt.f32 %v1364_v37 }
 0xad6   :  { %v3350_v38 = vpop.eup %3349 }
 0xad7   :  { %v1369_v40 = vmul.f32 %v3350_v38, %v1353_v18 }
 0xad8   :  { %v3352_v41 = vpop.eup %3351 }
 0xad9   :  { %v1368_v42 = vmul.f32 %v3352_v41, %v1352_v20  ;;  %v1377_v43 = vmul.f32 %v2935_v39, %v1369_v40 }
 0xadb   :  { %v1376_v45 = vmul.f32 %v2935_v39, %v1368_v42  ;;  %v3802_v48 = vadd.f32 %v2936_v44, %v1377_v43 }
 0xadd   :  { %v3800_v47 = vadd.f32 %v2936_v44, %v1376_v45  ;;  %v2958_v45 = vld [vmem:[%s4032_s7 + $0x28] sm:$0xff] }
 0xadf   :  { %3205 = vmatprep.mubr.msk.f32.mxu0 %vm88_vm0, %v3800_v47 }
 0xae0   :  { %3206 = vmatmul.mubr.msk.f32.vlgmr.msra.gmra.mxu0 %vm88_vm0, %v3802_v48 }
 0xae1   :  { %3210 = vmatprep.mubr.msk.f32.mxu0 %vm3431_vm1, %v3430_v34 }
 0xba0   :  { %v3207_v50 = vpop.f32.mrf.mxu0 }
 0xba1   :  { %v1477_v52 = vadd.f32 %v3207_v50, %v2942_v49 }
 0xba2   :  { %v1471_v53 = vpop.f32.mrf.mxu0 }
 0xba3   :  { %v3813_v54 = vadd.f32 %v2942_v49, %v1471_v53  ;;  %1484 = vrot.lane.b32.xlu1 %v1477_v52, %s3432_s3  ;;  %v2957_v53 = vld [vmem:[%s4032_s7 + $0x20] sm:$0xff] }
 0xba5   :  { %1481 = vrot.lane.b32.xlu0 %v3813_v54, %s3432_s3 }
 0xba7   :  { %1486 = vrot.lane.b32.xlu1 %v3813_v54, %s3433_s28 }
 0xba9   :  { %1638 = vrot.lane.b32.xlu0 %v1477_v52, %s3433_s28 }
 0xc15   :  { %v3821_v56 = vpop.permute.xlu1 %1484 }
 0xc17   :  { %v1482_v57 = vpop.permute.xlu0 %1481 }
 0xc18   :  { %1562 = vrot.lane.b32.xlu1 %v1482_v57, %s3433_s28 }
 0xc19   :  { %v1487_v58 = vpop.permute.xlu1 %1486 }
 0xc1a   :  { %3209 = vmatpush3.xpose.msk.msra.mxu0 %vm260_vm2, %v1487_v58 }
 0xc1b   :  { %3218 = vmatprep.subr.mxu0 %v3430_v34  ;;  %v1639_v59 = vpop.permute.xlu0 %1638 }
 0xc1c   :  { %1714 = vrot.lane.b32.xlu1 %v3821_v56, %s3433_s28 }
 0xc1d   :  { %3211 = vmatmul.mubr.msk.f32.vlgmr.msra.gmra.mxu0 %vm260_vm2, %v3813_v54 }
 0xc1e   :  { %3219 = vmatpush3.xpose.msk.msra.mxu0 %vm260_vm2, %v1639_v59  ;;  %3220 = vmatprep.mubr.msk.f32.mxu0 %vm3431_vm1, %v3430_v34 }
 0xc1f   :  { %3228 = vmatprep.subr.mxu0 %v3430_v34 }
 0xc21   :  { %3221 = vmatmul.mubr.msk.f32.vlgmr.msra.gmra.mxu0 %vm260_vm2, %v1477_v52 }
 0xc22   :  { %3230 = vmatprep.mubr.msk.f32.mxu0 %vm3431_vm1, %v3430_v34 }
 0xc8a   :  { %v1563_v61 = vpop.permute.xlu1 %1562 }
 0xc8b   :  { %3214 = vmatpush3.xpose.msk.msra.mxu1 %vm260_vm2, %v1563_v61 }
 0xc8c   :  { %3223 = vmatprep.subr.mxu1 %v3430_v34 }
 0xc8e   :  { %3216 = vmatmul.mubr.msk.f32.vlgmr.msra.gmra.mxu1 %vm260_vm2, %v1482_v57  ;;  %v1715_v62 = vpop.permute.xlu1 %1714 }
 0xc8f   :  { %3224 = vmatpush3.xpose.msk.msra.mxu1 %vm260_vm2, %v1715_v62  ;;  %3225 = vmatprep.mubr.msk.f32.mxu1 %vm3431_vm1, %v3430_v34 }
 0xc90   :  { %3233 = vmatprep.subr.mxu1 %v3430_v34 }
 0xc92   :  { %3226 = vmatmul.mubr.msk.f32.vlgmr.msra.gmra.mxu1 %vm260_vm2, %v3821_v56 }
 0xc93   :  { %3235 = vmatprep.mubr.msk.f32.mxu1 %vm3431_vm1, %v3430_v34 }
 0xcdd   :  { %v1558_v63 = vpop.f32.mrf.mxu0 }
 0xcde   :  { %v1559_v0 = vadd.f32 %v3646_v46, %v1558_v63 }
 0xcdf   :  { %v3212_v1 = vpop.f32.mrf.mxu0 }
 0xce0   :  { %v1790_v2 = vsel %vm563_vm3, %v1559_v0, -inf }
 0xce1   :  { %1791 = vmax.xlane.f32.xlu0 %v1790_v2  ;;  %v1710_v3 = vpop.f32.mrf.mxu0 }
 0xce2   :  { %v1711_v4 = vadd.f32 %v3659_v55, %v1710_v3 }
 0xce3   :  { %v3222_v5 = vpop.f32.mrf.mxu0 }
 0xce4   :  { %v1796_v6 = vsel %vm563_vm3, %v1711_v4, -inf }
 0xce5   :  { %1797 = vmax.xlane.f32.xlu0 %v1796_v6 }
 0xd4e   :  { %v1634_v7 = vpop.f32.mrf.mxu1 }
 0xd4f   :  { %v1635_v8 = vadd.f32 %v3653_v51, %v1634_v7 }
 0xd50   :  { %v3217_v9 = vpop.f32.mrf.mxu1 }
 0xd51   :  { %v1793_v10 = vsel %vm563_vm3, %v1635_v8, -inf }
 0xd52   :  { %1794 = vmax.xlane.f32.xlu1 %v1793_v10  ;;  %v1786_v11 = vpop.f32.mrf.mxu1 }
 0xd53   :  { %v1787_v46 = vadd.f32 %v3666_v60, %v1786_v11 }
 0xd54   :  { %v3227_v12 = vpop.f32.mrf.mxu1 }
 0xd55   :  { %v1799_v13 = vsel %vm563_vm3, %v1787_v46, -inf }
 0xd56   :  { %1800 = vmax.xlane.f32.xlu0 %v1799_v13 }
 0xd63   :  { %1910 = vrot.lane.b32.xlu1 %v1482_v57, %s3434_s25 }
 0xd67   :  { %1986 = vrot.lane.b32.xlu1 %v1477_v52, %s3434_s25 }
 0xd6a   :  { %v1792_v55 = vpop.xlane.xlu0 %1791 }
 0xd6b   :  { %v1802_v14 = vsub.f32 %v1559_v0, %v1792_v55 }
 0xd6d   :  { %v1806_v33 = vmul.f32 1.442695, %v1802_v14 }
 0xd6e   :  { %v1798_v31 = vpop.xlane.xlu0 %1797 }
 0xd6f   :  { %3353 = vpow2.f32 %v1806_v33  ;;  %v1804_v51 = vsub.f32 %v1711_v4, %v1798_v31  ;;  %v2966_v4 = vld [vmem:[%s4033_s8 + $0x1] ss:$0 sm:$0xff] }
 0xd71   :  { %v1810_v15 = vmul.f32 1.442695, %v1804_v51 }
 0xd73   :  { %3355 = vpow2.f32 %v1810_v15 }
 0xd7c   :  { %v3354_v16 = vpop.eup %3353 }
 0xd7d   :  { %v1814_v17 = vsel %vm563_vm3, %v3354_v16, 0.0 }
 0xd7e   :  { %1815 = vadd.xlane.f32.xlu0 %v1814_v17 }
 0xd80   :  { %v3356_v60 = vpop.eup %3355 }
 0xd81   :  { %v1820_v18 = vsel %vm563_vm3, %v3356_v60, 0.0 }
 0xd82   :  { %1821 = vadd.xlane.f32.xlu0 %v1820_v18  ;;  %v2973_v18 = vld [vmem:[%s4036_s11 + $0x30] sm:$0xff] }
 0xd98   :  { %1834 = vrot.lane.b32.xlu0 %v3813_v54, %s3434_s25  ;;  %v2960_v54 = vld [vmem:[%s4032_s7 + $0x38] sm:$0xff] }
 0xddb   :  { %v1795_v19 = vpop.xlane.xlu1 %1794 }
 0xddc   :  { %v1803_v20 = vsub.f32 %v1635_v8, %v1795_v19  ;;  %v2972_v19 = vld [vmem:[%s4036_s11 + $0x28] sm:$0xff] }
 0xdde   :  { %v1808_v21 = vmul.f32 1.442695, %v1803_v20  ;;  %v2971_v20 = vld [vmem:[%s4036_s11 + $0x20] sm:$0xff] }
 0xddf   :  { %v1911_v22 = vpop.permute.xlu1 %1910  ;;  %v1801_v23 = vpop.xlane.xlu0 %1800 }
 0xde0   :  { %3357 = vpow2.f32 %v1808_v21  ;;  %v1805_v24 = vsub.f32 %v1787_v46, %v1801_v23  ;;  %3234 = vmatpush3.msra.mxu1 %v1911_v22 }
 0xde1   :  { %3243 = vmatprep.subr.mxu1 %v3430_v34 }
 0xde2   :  { %v1812_v25 = vmul.f32 1.442695, %v1805_v24 }
 0xde3   :  { %v1987_v38 = vpop.permute.xlu1 %1986 }
 0xde4   :  { %3359 = vpow2.f32 %v1812_v25 }
 0xded   :  { %v3358_v26 = vpop.eup %3357 }
 0xdee   :  { %v1817_v27 = vsel %vm563_vm3, %v3358_v26, 0.0 }
 0xdef   :  { %1818 = vadd.xlane.f32.xlu1 %v1817_v27 }
 0xdf1   :  { %v3360_v28 = vpop.eup %3359 }
 0xdf2   :  { %v1823_v29 = vsel %vm563_vm3, %v3360_v28, 0.0 }
 0xdf3   :  { %1824 = vadd.xlane.f32.xlu1 %v1823_v29 }
 0xe04   :  { %2062 = vrot.lane.b32.xlu1 %v3821_v56, %s3434_s25  ;;  %v2959_v56 = vld [vmem:[%s4032_s7 + $0x30] sm:$0xff]  ;;  %s3435_s25 = smov [#allocation5]  }
 0xe07   :  { %v1816_v30 = vpop.xlane.xlu0 %1815 }
 0xe08   :  { %3361 = vrcp.f32 %v1816_v30  ;;  %v2970_v30 = vld [vmem:[%s4035_s10 + $0x1] ss:$0 sm:$0xff] }
 0xe0b   :  { %v1822_v32 = vpop.xlane.xlu0 %1821 }
 0xe0c   :  { %3363 = vrcp.f32 %v1822_v32 }
 0xe0f   :  { %v1835_v35 = vpop.permute.xlu0 %1834 }
 0xe10   :  { %3229 = vmatpush3.msra.mxu0 %v1835_v35 }
 0xe11   :  { %3238 = vmatprep.subr.mxu0 %v3430_v34 }
 0xe15   :  { %v3362_v36 = vpop.eup %3361 }
 0xe16   :  { %v1830_v37 = vmul.f32 %v3362_v36, %v3354_v16 }
 0xe18   :  { %3231 = vmatmul.mubr.msk.f32.vlgmr.msra.gmra.mxu0 %vm563_vm3, %v1830_v37 }
 0xe19   :  { %v3364_v39 = vpop.eup %3363  ;;  %3239 = vmatpush3.msra.mxu0 %v1987_v38  ;;  %3240 = vmatprep.mubr.msk.f32.mxu0 %vm3431_vm1, %v3430_v34 }
 0xe1a   :  { %v1832_v40 = vmul.f32 %v3364_v39, %v3356_v60  ;;  %3248 = vmatprep.subr.mxu0 %v2960_v54 }
 0xe1c   :  { %3241 = vmatmul.mubr.msk.f32.vlgmr.msra.gmra.mxu0 %vm563_vm3, %v1832_v40  ;;  %v2986_v40 = vld [vmem:[%s4038_s13 + $0x78] sm:$0xff] }
 0xe1d   :  { %3249 = vmatpush3.msra.mxu0 %v2960_v54 }
 0xe1e   :  { %3250 = vmatprep.subr.mxu0 %v2959_v56 }
 0xe1f   :  { %3251 = vmatpush3.msra.mxu0 %v2959_v56 }
 0xe78   :  { %v1819_v41 = vpop.xlane.xlu1 %1818 }
 0xe79   :  { %3365 = vrcp.f32 %v1819_v41  ;;  %v2985_v41 = vld [vmem:[%s4038_s13 + $0x70] sm:$0xff] }
 0xe7c   :  { %v1825_v42 = vpop.xlane.xlu1 %1824 }
 0xe7d   :  { %3367 = vrcp.f32 %v1825_v42  ;;  %v2984_v42 = vld [vmem:[%s4038_s13 + $0x68] sm:$0xff] }
 0xe80   :  { %v2063_v49 = vpop.permute.xlu1 %2062 }
 0xe86   :  { %v3366_v43 = vpop.eup %3365 }
 0xe87   :  { %v1831_v44 = vmul.f32 %v3366_v43, %v3358_v26  ;;  %v2983_v43 = vld [vmem:[%s4038_s13 + $0x60] sm:$0xff] }
 0xe89   :  { %3236 = vmatmul.mubr.msk.f32.vlgmr.msra.gmra.mxu1 %vm563_vm3, %v1831_v44  ;;  %v2982_v44 = vld [vmem:[%s4038_s13 + $0x58] sm:$0xff] }
 0xe8a   :  { %v3368_v50 = vpop.eup %3367  ;;  %3244 = vmatpush3.msra.mxu1 %v2063_v49  ;;  %3245 = vmatprep.mubr.msk.f32.mxu1 %vm3431_vm1, %v3430_v34  ;;  %v2980_v49 = vld [vmem:[%s4038_s13 + $0x48] sm:$0xff] }
 0xe8b   :  { %v1833_v52 = vmul.f32 %v3368_v50, %v3360_v28  ;;  %3255 = vmatprep.subr.mxu1 %v2958_v45  ;;  %v2969_v28 = vld [vmem:[%s4034_s9 + $0x1] ss:$0 sm:$0xff] }
 0xe8c   :  { %v2979_v50 = vld [vmem:[%s4038_s13 + $0x40] sm:$0xff] }
 0xe8d   :  { %3246 = vmatmul.mubr.msk.f32.vlgmr.msra.gmra.mxu1 %vm563_vm3, %v1833_v52  ;;  %v2976_v52 = vld [vmem:[%s4037_s12 + $0x1] ss:$0 sm:$0xff] }
 0xe8e   :  { %3256 = vmatpush3.msra.mxu1 %v2958_v45  ;;  %v2981_v45 = vld [vmem:[%s4038_s13 + $0x50] sm:$0xff] }
 0xe8f   :  { %3257 = vmatprep.subr.mxu1 %v2957_v53 }
 0xe90   :  { %3258 = vmatpush3.msra.mxu1 %v2957_v53 }
 0xe91   :  { %3273 = vmatprep.subr.mxu1 %v2986_v40 }
 0xed8   :  { %v1906_v57 = vpop.f32.mrf.mxu0 }
 0xed9   :  { %3259 = vmatprep.mubr.msk.f32.mxu1 %vm260_vm2, %v1906_v57 }
 0xeda   :  { %v3232_v58 = vpop.f32.mrf.mxu0 }
 0xedc   :  { %v2058_v59 = vpop.f32.mrf.mxu0 }
 0xedd   :  { %3260 = vmatmul.mubr.msk.f32.vlgmr.msra.gmra.mxu1 %vm260_vm2, %v2058_v59 }
 0xede   :  { %v3242_v61 = vpop.f32.mrf.mxu0  ;;  %3274 = vmatpush3.msra.mxu1 %v2986_v40 }
 0xedf   :  { %3275 = vmatprep.subr.mxu1 %v2985_v41 }
 0xee0   :  { %3276 = vmatpush3.msra.mxu1 %v2985_v41  ;;  %v2994_v41 = vld [vmem:[%s4041_s16 + $0x1] ss:$0 sm:$0xff] }
 0xee1   :  { %3277 = vmatprep.subr.mxu1 %v2984_v42 }
 0xee2   :  { %3278 = vmatpush3.msra.mxu1 %v2984_v42 }
 0xee3   :  { %3279 = vmatprep.subr.mxu1 %v2983_v43 }
 0xee4   :  { %3280 = vmatpush3.msra.mxu1 %v2983_v43 }
 0xee5   :  { %3281 = vmatprep.subr.mxu1 %v2982_v44 }
 0xee6   :  { %3282 = vmatpush3.msra.mxu1 %v2982_v44 }
 0xee7   :  { %3283 = vmatprep.subr.mxu1 %v2981_v45 }
 0xee8   :  { %3284 = vmatpush3.msra.mxu1 %v2981_v45 }
 0xee9   :  { %3285 = vmatprep.subr.mxu1 %v2980_v49 }
 0xeea   :  { %3286 = vmatpush3.msra.mxu1 %v2980_v49 }
 0xeeb   :  { %3287 = vmatprep.subr.mxu1 %v2979_v50 }
 0xeec   :  { %3288 = vmatpush3.msra.mxu1 %v2979_v50 }
 0xf49   :  { %v1982_v62 = vpop.f32.mrf.mxu1 }
 0xf4a   :  { %3252 = vmatprep.mubr.msk.f32.mxu0 %vm260_vm2, %v1982_v62 }
 0xf4b   :  { %v3237_v63 = vpop.f32.mrf.mxu1 }
 0xf4d   :  { %v2134_v0 = vpop.f32.mrf.mxu1 }
 0xf4e   :  { %3253 = vmatmul.mubr.msk.f32.vlgmr.msra.gmra.mxu0 %vm260_vm2, %v2134_v0 }
 0xf4f   :  { %v3247_v1 = vpop.f32.mrf.mxu1 }
 0xf9d   :  { %v3261_v2 = vpop.f32.mrf.mxu1 }
 0xf9f   :  { %v2296_v6 = vpop.f32.mrf.mxu1 }
0x100e   :  { %v3254_v3 = vpop.f32.mrf.mxu0 }
0x100f   :  { %v2302_v5 = vadd.f32 %v3261_v2, %v3254_v3 }
0x1010   :  { %v2215_v7 = vpop.f32.mrf.mxu0 }
0x1011   :  { %v2314_v8 = vadd.f32 %v2966_v4, %v2302_v5  ;;  %v2297_v9 = vadd.f32 %v2296_v6, %v2215_v7 }
0x1013   :  { %v2313_v10 = vadd.f32 %v2966_v4, %v2297_v9  ;;  %v2316_v11 = vadd.f32 %v2314_v8, %v3802_v48 }
0x1015   :  { %v2324_v46 = vsel %vm88_vm0, %v2316_v11, 0.0  ;;  %v2315_v12 = vadd.f32 %v2313_v10, %v3800_v47  ;;  %v2974_v47 = vld [vmem:[%s4036_s11 + $0x38] sm:$0xff]  ;;  %s2890_s11 = sshll.u32 %s3435_s25, 4  ;;  %s2891_s11 = int_to_ptr.vmem [resolvable:$true] %s2890_s11 }
0x1016   :  { %2325 = vadd.xlane.f32.xlu1 %v2324_v46  ;;  %3262 = vmatprep.subr.mxu0 %v2974_v47  ;;  %s3405_s9 = scalar_lea.vmem %s2891_s11, 16  ;;  %s3409_s23 = scalar_lea.vmem %s2891_s11, 32 }
0x1017   :  { %v2321_v13 = vsel %vm88_vm0, %v2315_v12, 0.0  ;;  %3263 = vmatpush3.msra.mxu0 %v2974_v47  ;;  %p3406_p7 = scmp.ne.s32.totalorder %s2891_s11, %s3405_s9  ;;  %p3410_p8 = scmp.lt.s32.totalorder %s2891_s11, %s2891_s11 }
0x1018   :  { %2322 = vadd.xlane.f32.xlu0 %v2321_v13  ;;  %3264 = vmatprep.subr.mxu0 %v2973_v18  ;;  %p3411_p9 = scmp.lt.s32.totalorder %s3409_s23, %s3405_s9 }
0x1019   :  { %3265 = vmatpush3.msra.mxu0 %v2973_v18 }
0x101a   :  { %3266 = vmatprep.subr.mxu0 %v2972_v19  ;;  %p3412_p10 = por %p3411_p9, %p3410_p8 }
0x101b   :  { %3267 = vmatpush3.msra.mxu0 %v2972_v19 }
0x101c   :  { %3268 = vmatprep.subr.mxu0 %v2971_v20  ;;  %p3413_p11 = pnand %p3412_p10, %p3406_p7 }
0x101d   :  { %3269 = vmatpush3.msra.mxu0 %v2971_v20 }
0x101e   :  { %3292 = vmatprep.subr.mxu0 %v3430_v34 }
0x109f   :  { %v2326_v55 = vpop.xlane.xlu1 %2325 }
0x10a0   :  { %v2328_v14 = vmul.f32 0.03125, %v2326_v55 }
0x10a1   :  { %v2323_v33 = vpop.xlane.xlu0 %2322 }
0x10a2   :  { %v2327_v31 = vmul.f32 0.03125, %v2323_v33  ;;  %v2330_v51 = vsub.f32 %v2316_v11, %v2328_v14 }
0x10a4   :  { %v2329_v15 = vsub.f32 %v2315_v12, %v2327_v31  ;;  %v2332_v60 = vmul.f32 %v2330_v51, %v2330_v51  ;;  %v2988_v12 = vld [vmem:[%s4039_s14 + $0x1] ss:$0 sm:$0xff] }
0x10a6   :  { %v2331_v16 = vmul.f32 %v2329_v15, %v2329_v15  ;;  %v2336_v48 = vsel %vm88_vm0, %v2332_v60, 0.0 }
0x10a8   :  { %v2333_v17 = vsel %vm88_vm0, %v2331_v16, 0.0 }
0x10a9   :  { %2334 = vadd.xlane.f32.xlu0 %v2333_v17 }
0x10ad   :  { %2337 = vadd.xlane.f32.xlu0 %v2336_v48 }
0x1132   :  { %v2335_v21 = vpop.xlane.xlu0 %2334 }
0x1133   :  { %v2339_v22 = vmul.f32 0.03125, %v2335_v21 }
0x1135   :  { %v2341_v23 = vadd.f32 1e-12, %v2339_v22 }
0x1136   :  { %v2338_v24 = vpop.xlane.xlu0 %2337 }
0x1137   :  { %3369 = vrsqrt.f32 %v2341_v23  ;;  %v2340_v25 = vmul.f32 0.03125, %v2338_v24  ;;  %v2624_v24 = vld [vmem:[%s4042_s17 + $0x18] sm:$0xff] }
0x1139   :  { %v2342_v26 = vadd.f32 1e-12, %v2340_v25  ;;  %v2623_v25 = vld [vmem:[%s4042_s17 + $0x10] sm:$0xff] }
0x113b   :  { %3371 = vrsqrt.f32 %v2342_v26  ;;  %v2622_v26 = vld [vmem:[%s4042_s17 + $0x8] sm:$0xff] }
0x1144   :  { %v3370_v27 = vpop.eup %3369 }
0x1145   :  { %v2345_v29 = vmul.f32 %v3370_v27, %v2329_v15  ;;  %v2621_v27 = vld [vmem:[%s4042_s17] sm:$0xff] }
0x1147   :  { %v2353_v32 = vmul.f32 %v2969_v28, %v2345_v29 }
0x1148   :  { %v3372_v35 = vpop.eup %3371 }
0x1149   :  { %v2346_v36 = vmul.f32 %v3372_v35, %v2330_v51  ;;  %v3920_v37 = vadd.f32 %v2970_v30, %v2353_v32 }
0x114b   :  { %v2354_v38 = vmul.f32 %v2969_v28, %v2346_v36  ;;  %3270 = vmatprep.mubr.msk.f32.mxu0 %vm88_vm0, %v3920_v37 }
0x114d   :  { %v2362_v39 = vadd.f32 %v2970_v30, %v2354_v38  ;;  %v2993_v38 = vld [vmem:[%s4040_s15 + $0x1] ss:$0 sm:$0xff] }
0x114f   :  { %3271 = vmatmul.mubr.msk.f32.vlgmr.msra.gmra.mxu0 %vm88_vm0, %v2362_v39 }
0x1150   :  { %3300 = vmatprep.mubr.msk.f32.mxu0 %vm3431_vm1, %v3430_v34  ;;  %3293 = vmatpush3.msra.mxu0 %v2624_v24 }
0x1151   :  { %3294 = vmatprep.subr.mxu0 %v3430_v34 }
0x1152   :  { %3295 = vmatpush3.msra.mxu0 %v2623_v25 }
0x1153   :  { %3296 = vmatprep.subr.mxu0 %v3430_v34 }
0x1154   :  { %3297 = vmatpush3.msra.mxu0 %v2622_v26 }
0x1155   :  { %3298 = vmatprep.subr.mxu0 %v3430_v34 }
0x1156   :  { %3299 = vmatpush3.msra.mxu0 %v2621_v27 }
0x1157   :  { %3303 = vmatprep.subr.mxu0 %v3430_v34 }
0x120f   :  { %v3272_v53 = vpop.f32.mrf.mxu0 }
0x1210   :  { %v2454_v54 = vadd.f32 %v3272_v53, %v2976_v52  ;;  %v2713_v53 = vld [vmem:[%s4044_s19 + $0x18] sm:$0xff] }
0x1211   :  { %v2448_v56 = vpop.f32.mrf.mxu0 }
0x1212   :  { %v2458_v57 = vmul.f32 %v2454_v54, %v2454_v54  ;;  %v2449_v58 = vadd.f32 %v2976_v52, %v2448_v56  ;;  %v2711_v56 = vld [vmem:[%s4044_s19 + $0x8] sm:$0xff] }
0x1214   :  { %v2460_v59 = vmul.f32 %v2458_v57, %v2454_v54  ;;  %v2457_v61 = vmul.f32 %v2449_v58, %v2449_v58  ;;  %v2710_v57 = vld [vmem:[%s4044_s19] sm:$0xff] }
0x1216   :  { %v2462_v62 = vmul.f32 0.044715, %v2460_v59  ;;  %v2459_v63 = vmul.f32 %v2457_v61, %v2449_v58 }
0x1218   :  { %v2464_v0 = vadd.f32 %v2462_v62, %v2454_v54  ;;  %v2461_v1 = vmul.f32 0.044715, %v2459_v63 }
0x121a   :  { %v2466_v2 = vmul.f32 0.7978846, %v2464_v0  ;;  %v2463_v3 = vadd.f32 %v2461_v1, %v2449_v58  ;;  %v2997_v0 = vld [vmem:[%s4045_s20] ss:$0 sm:$0xff] }
0x121c   :  { %3373 = vtanh.f32 %v2466_v2  ;;  %v2465_v4 = vmul.f32 0.7978846, %v2463_v3 }
0x121e   :  { %3375 = vtanh.f32 %v2465_v4 }
0x1229   :  { %v3374_v5 = vpop.eup %3373 }
0x122a   :  { %v2470_v6 = vadd.f32 1.0, %v3374_v5 }
0x122b   :  { %v3376_v7 = vpop.eup %3375 }
0x122c   :  { %v2469_v8 = vadd.f32 1.0, %v3376_v7  ;;  %v2472_v9 = vmul.f32 0.5, %v2470_v6  ;;  %v2794_v6 = vlaneseq }
0x122e   :  { %v2471_v10 = vmul.f32 0.5, %v2469_v8  ;;  %v2474_v46 = vmul.f32 %v2472_v9, %v2454_v54  ;;  %v2712_v54 = vld [vmem:[%s4044_s19 + $0x10] sm:$0xff]  ;;  %v2795_v8 = vand.u32 127, %v2794_v6  ;;  %s2819_s19 = sld [smem:[#allocation2]] }
0x1230   :  { %v2473_v11 = vmul.f32 %v2471_v10, %v2449_v58  ;;  %v2995_v58 = vld [vmem:[%s4043_s18] ss:$0 sm:$0xff]  ;;  %s2999_s18 = sld [smem:[#allocation2 + $0x1]] }
0x1232   :  { %3289 = vmatprep.mubr.msk.f32.mxu1 %vm1258_vm4, %v2473_v11 }
0x1233   :  { %3290 = vmatmul.mubr.msk.f32.vlgmr.msra.gmra.mxu1 %vm1258_vm4, %v2474_v46 }
0x1234   :  { %p2839_p6 = scmp.ne.s32.totalorder %s2819_s19, 4294967295 }
0x1236   :  { %p2867_p5 = scmp.ne.s32.totalorder %s2999_s18, 4294967295 }
0x1237   :  { %s2840_s12 = scalar_select %p2839_p6, 1, 0 }
0x1238   :  { %s2868_s20 = scalar_select %p2867_p5, 1, 0 }
0x1239   :  { %s2841_s14 = scvt.s32.f32 %s2840_s12 }
0x123a   :  { %s2869_s13 = scvt.s32.f32 %s2868_s20 }
0x123c   :  { %v2871_v27 = vstv %s2869_s13 }
0x12f3   :  { %v3291_v13 = vpop.f32.mrf.mxu1 }
0x12f4   :  { %v2570_v55 = vadd.f32 %v3291_v13, %v2988_v12 }
0x12f5   :  { %v2564_v14 = vpop.f32.mrf.mxu1 }
0x12f6   :  { %v2565_v33 = vadd.f32 %v2988_v12, %v2564_v14  ;;  %v2574_v31 = vadd.f32 %v2570_v55, %v2362_v39 }
0x12f8   :  { %v2582_v51 = vsel %vm88_vm0, %v2574_v31, 0.0  ;;  %v2573_v15 = vadd.f32 %v2565_v33, %v3920_v37 }
0x12f9   :  { %2583 = vadd.xlane.f32.xlu0 %v2582_v51  ;;  %v2861_v51 = vstv %s2999_s18 }
0x12fa   :  { %v2579_v16 = vsel %vm88_vm0, %v2573_v15, 0.0  ;;  %vm2862_vm10 = vcmp.eq.s32.totalorder %v2795_v8, %v2861_v51 }
0x12fb   :  { %2580 = vadd.xlane.f32.xlu1 %v2579_v16  ;;  %v2833_v16 = vstv %s2819_s19 }
0x12fc   :  { %vm2834_vm11 = vcmp.eq.s32.totalorder %v2795_v8, %v2833_v16 }
0x1382   :  { %v2584_v17 = vpop.xlane.xlu0 %2583 }
0x1383   :  { %v2586_v60 = vmul.f32 0.03125, %v2584_v17 }
0x1384   :  { %v2581_v48 = vpop.xlane.xlu1 %2580 }
0x1385   :  { %v2588_v47 = vsub.f32 %v2574_v31, %v2586_v60  ;;  %v2585_v18 = vmul.f32 0.03125, %v2581_v48 }
0x1387   :  { %v2587_v19 = vsub.f32 %v2573_v15, %v2585_v18  ;;  %v2590_v20 = vmul.f32 %v2588_v47, %v2588_v47 }
0x1389   :  { %v2594_v21 = vsel %vm88_vm0, %v2590_v20, 0.0  ;;  %v2589_v22 = vmul.f32 %v2587_v19, %v2587_v19 }
0x138a   :  { %2595 = vadd.xlane.f32.xlu0 %v2594_v21 }
0x138b   :  { %v2591_v23 = vsel %vm88_vm0, %v2589_v22, 0.0 }
0x138c   :  { %2592 = vadd.xlane.f32.xlu1 %v2591_v23 }
0x1413   :  { %v2596_v28 = vpop.xlane.xlu0 %2595 }
0x1414   :  { %v2598_v29 = vmul.f32 0.03125, %v2596_v28  ;;  %v2843_v28 = vstv %s2841_s14 }
0x1415   :  { %v2593_v30 = vpop.xlane.xlu1 %2592 }
0x1416   :  { %v2600_v32 = vadd.f32 1e-12, %v2598_v29  ;;  %v2597_v35 = vmul.f32 0.03125, %v2593_v30  ;;  %v2877_v29 = vadd.f32 %v2871_v27, %v2843_v28 }
0x1418   :  { %3377 = vrsqrt.f32 %v2600_v32  ;;  %v2599_v36 = vadd.f32 1e-12, %v2597_v35 }
0x141a   :  { %3379 = vrsqrt.f32 %v2599_v36 }
0x1425   :  { %v3378_v37 = vpop.eup %3377 }
0x1426   :  { %v2604_v39 = vmul.f32 %v3378_v37, %v2588_v47 }
0x1427   :  { %v3380_v40 = vpop.eup %3379 }
0x1428   :  { %v2603_v42 = vmul.f32 %v3380_v40, %v2587_v19  ;;  %v2612_v43 = vmul.f32 %v2993_v38, %v2604_v39 }
0x142a   :  { %v2611_v44 = vmul.f32 %v2993_v38, %v2603_v42  ;;  %v2620_v45 = vadd.f32 %v2994_v41, %v2612_v43 }
0x142c   :  { %v2619_v49 = vadd.f32 %v2994_v41, %v2611_v44  ;;  %v2634_v50 = vrot.slane %v2620_v45, 7 }
0x142e   :  { %v2636_v52 = vsel %vm2635_vm5, %v2634_v50, %v2619_v49 }
0x142f   :  { %3301 = vmatmul.mubr.msk.f32.vlgmr.msra.gmra.mxu0 %vm88_vm0, %v2636_v52 }
0x1430   :  { %3311 = vmatprep.mubr.msk.f32.mxu0 %vm3431_vm1, %v3430_v34  ;;  %3304 = vmatpush3.msra.mxu0 %v2713_v53 }
0x1431   :  { %3305 = vmatprep.subr.mxu0 %v3430_v34 }
0x1432   :  { %3306 = vmatpush3.msra.mxu0 %v2712_v54 }
0x1433   :  { %3307 = vmatprep.subr.mxu0 %v3430_v34 }
0x1434   :  { %3308 = vmatpush3.msra.mxu0 %v2711_v56 }
0x1435   :  { %3309 = vmatprep.subr.mxu0 %v3430_v34 }
0x1436   :  { %3310 = vmatpush3.msra.mxu0 %v2710_v57 }
0x14ef   :  { %v2705_v59 = vpop.f32.mrf.mxu0 }
0x14f0   :  { %v2706_v61 = vadd.f32 %v2995_v58, %v2705_v59 }
0x14f1   :  { %v3302_v62 = vpop.f32.mrf.mxu0 }
0x14f2   :  { %3381 = vtanh.f32 %v2706_v61 }
0x14ff   :  { %v3382_v63 = vpop.eup %3381 }
0x1500   :  { %3312 = vmatmul.mubr.msk.f32.vlgmr.msra.gmra.mxu0 %vm88_vm0, %v3382_v63 }
0x15c0   :  { %v2790_v1 = vpop.f32.mrf.mxu0 }
0x15c1   :  { %v2791_v34 = vadd.f32 %v2997_v0, %v2790_v1 }
0x15c2   :  { %v3313_v2 = vpop.f32.mrf.mxu0 }
0x15c3   :  { %v2849_v3 = vsel %vm2848_vm6, %v2791_v34, -inf  ;;  %v2797_v4 = vsel %vm2796_vm7, %v2791_v34, -inf  ;;  %v2821_v5 = vsel %vm2820_vm8, %v2791_v34, -inf  ;;  %v2863_v60 = vsel %vm2862_vm10, %v2791_v34, 0.0 }
0x15c4   :  { %2850 = vmax.xlane.f32.xlu1 %v2849_v3  ;;  %2798 = vmax.xlane.f32.xlu0 %v2797_v4  ;;  %v2864_v47 = vsel %vm2848_vm6, %v2863_v60, 0.0  ;;  %v2835_v19 = vsel %vm2834_vm11, %v2791_v34, 0.0 }
0x15c5   :  { %v2836_v20 = vsel %vm2820_vm8, %v2835_v19, 0.0 }
0x15c8   :  { %2822 = vmax.xlane.f32.xlu0 %v2821_v5 }
0x164d   :  { %v2851_v7 = vpop.xlane.xlu1 %2850  ;;  %v2799_v9 = vpop.xlane.xlu0 %2798 }
0x164e   :  { %v2852_v10 = vsub.f32 %v2791_v34, %v2851_v7  ;;  %vm2800_vm9 = vcmp.eq.f32.partialorder %v2791_v34, %v2799_v9 }
0x164f   :  { %v2801_v11 = vsel %vm2800_vm9, %v2795_v8, 4 }
0x1650   :  { %v2853_v46 = vmul.f32 1.442695, %v2852_v10  ;;  %v2802_v12 = vsel %vm2796_vm7, %v2801_v11, 2147483647 }
0x1651   :  { %v2823_v13 = vpop.xlane.xlu0 %2822  ;;  %v2804_v55 = vshra.s32 %v2802_v12, 16  ;;  %v2803_v21 = vand.u32 65535, %v2802_v12 }
0x1652   :  { %3383 = vpow2.f32 %v2853_v46  ;;  %v2824_v14 = vsub.f32 %v2791_v34, %v2823_v13 }
0x1653   :  { %v2806_v33 = vcvt.s32.f32 %v2804_v55  ;;  %v2805_v23 = vcvt.s32.f32 %v2803_v21 }
0x1654   :  { %v2825_v31 = vmul.f32 1.442695, %v2824_v14 }
0x1655   :  { %2807 = vmin.xlane.f32.xlu1 %v2806_v33 }
0x1656   :  { %3385 = vpow2.f32 %v2825_v31 }
0x165f   :  { %v3384_v15 = vpop.eup %3383 }
0x1660   :  { %v2855_v17 = vsel %vm2848_vm6, %v3384_v15, 0.0 }
0x1661   :  { %2856 = vadd.xlane.f32.xlu0 %v2855_v17 }
0x1663   :  { %v3386_v48 = vpop.eup %3385 }
0x1664   :  { %v2827_v18 = vsel %vm2820_vm8, %v3386_v48, 0.0 }
0x1665   :  { %2865 = vadd.xlane.f32.xlu0 %v2864_v47  ;;  %2828 = vadd.xlane.f32.xlu1 %v2827_v18 }
0x1669   :  { %2837 = vadd.xlane.f32.xlu1 %v2836_v20 }
0x16de   :  { %v2808_v22 = vpop.xlane.xlu1 %2807 }
0x16df   :  { %vm2809_vm12 = vcmp.eq.f32.partialorder %v2806_v33, %v2808_v22 }
0x16e0   :  { %v2810_v24 = vsel %vm2809_vm12, %v2805_v23, inf }
0x16e1   :  { %2811 = vmin.xlane.f32.xlu0 %v2810_v24 }
0x16ea   :  { %v2857_v25 = vpop.xlane.xlu0 %2856 }
0x16eb   :  { %3387 = vlog2.f32 %v2857_v25 }
0x16ee   :  { %v2829_v26 = vpop.xlane.xlu1 %2828  ;;  %v2866_v37 = vpop.xlane.xlu0 %2865 }
0x16ef   :  { %3389 = vlog2.f32 %v2829_v26 }
0x16f0   :  { %3391 = vrcp.f32 %v2877_v29 }
0x16f2   :  { %v2838_v42 = vpop.xlane.xlu1 %2837 }
0x16f8   :  { %v3388_v30 = vpop.eup %3387 }
0x16f9   :  { %v2859_v32 = vmul.f32 0.6931472, %v3388_v30 }
0x16fb   :  { %v2860_v35 = vadd.f32 %v2859_v32, %v2851_v7 }
0x16fc   :  { %v3390_v36 = vpop.eup %3389 }
0x16fd   :  { %v2831_v38 = vmul.f32 0.6931472, %v3390_v36  ;;  %v2870_v39 = vsub.f32 %v2860_v35, %v2866_v37  ;;  %v3392_v49 = vpop.eup %3391 }
0x16ff   :  { %v2872_v40 = vmul.f32 %v2871_v27, %v2870_v39  ;;  %v2832_v41 = vadd.f32 %v2831_v38, %v2823_v13 }
0x1701   :  { %v2842_v43 = vsub.f32 %v2832_v41, %v2838_v42  ;;  %v2874_v44 = vrot.slane %v2872_v40, 1 }
0x1703   :  { %v2844_v45 = vmul.f32 %v2843_v28, %v2842_v43 }
0x1705   :  { %v2876_v50 = vadd.f32 %v2874_v44, %v2844_v45 }
0x1707   :  { %v2879_v52 = vmul.f32 %v3392_v49, %v2876_v50 }
0x1709   :  { %2881 = vst.msk [vmem:[#allocation5] sm:$0x1] %vm2880_vm13, %v2879_v52 }
0x170a   :  { %3416 = shalt.err (!%p3413_p11)
}
0x170b   :  { %2893 = dma.vmem_to_hbm [thread:$0]  %s2891_s11, 16, %s4047_s22, [#allocation3]   ;;  %v2814_v53 = vcvt.f32.s32 %v2808_v22  ;;  %vm2817_vm14 = vcmask 1024  }
0x170d   :  { %v2815_v56 = vshll.u32 %v2814_v53, 16 }
0x176a   :  { %v2812_v54 = vpop.xlane.xlu0 %2811 }
0x176b   :  { %v2813_v57 = vcvt.f32.s32 %v2812_v54 }
0x176d   :  { %v2816_v58 = vadd.s32 %v2815_v56, %v2813_v57 }
0x176f   :  { %2818 = vst.msk [vmem:[%s4046_s21] sm:$0x3] %vm2817_vm14, %v2816_v58 }
0x1770   :  { %3427 = dma.done.wait [#allocation3], 16  }
0x1771   :  { %3428 = vsyncadd [#allocation3], 4294967280 }
0x1772   :  { %2899 = vsyncpa [#allocation3], 1 }
0x1773   :  { %2900 = vsyncpa [#allocation4], 1 }

</bundles_post_ra>
